<compile_context>
chip_gen: v7x
topology: tpu7x:2x2x1
jax: 0.10.0
libtpu: 0.0.40
codegen_flags: <defaults>
</compile_context>

<pallas_src>
import functools

import numpy as np
import jax
import jax.numpy as jnp
from jax.experimental import pallas as pl
from jax.experimental.pallas import tpu as pltpu

# ---------------- model hyper-parameters (module defaults) ----------------
DIM = 2            # dimensionality
L1 = 12            # architecture[0]
L2 = 6             # architecture[1]
LAT = 3            # latent_dimensionality
BN_EPS = 1e-5

B = 8              # demo batch (full sublane group -> BN stats need no masking)
D = 128            # padded feature width (lane dim)

# (in, out) of the 11 nn.Linear layers, in execution order
LINEAR_DIMS = [
    (DIM, L1),   # 0  linear1
    (L1, L2),    # 1  linear2
    (L2, L2),    # 2  linear3
    (L2, LAT),   # 3  fc1
    (LAT, LAT),  # 4  fc21  (mu)     -- bias kept (no BN follows)
    (LAT, LAT),  # 5  fc22  (logvar) -- bias kept (no BN follows)
    (LAT, LAT),  # 6  fc3
    (LAT, L2),   # 7  fc4
    (L2, L2),    # 8  linear4
    (L2, L1),    # 9  linear5
    (L1, DIM),   # 10 linear6
]
# feature width of the 9 BatchNorm1d layers, in execution order
BN_DIMS = [L1, L2, L2, LAT, LAT, L2, L2, L1, DIM]

N_LIN = len(LINEAR_DIMS)           # 11
N_BN = len(BN_DIMS)                # 9
BIAS_OFF = 0                       # rows 0..10  of packed params
GAMMA_OFF = N_LIN                  # rows 11..19
BETA_OFF = N_LIN + N_BN            # rows 20..28
N_PARAM_ROWS = N_LIN + 2 * N_BN    # 29


# ------------------------------ kernel ------------------------------------
def sb_vae_kernel(xe_ref, w_ref, p_ref, out_ref):
    # xe_ref : (2, B, D) f32   row 0 = x (lane-padded), row 1 = eps (lane-padded)
    # w_ref  : (11, D, D) bf16 packed W.T, zero-padded
    # p_ref  : (29, D) f32     biases / gammas / betas
    # out_ref: (3, B, D) f32   row 0 = recon, row 1 = mu, row 2 = logvar
    p_all = p_ref[...]                       # (29, D)
    inv_b = 1.0 / float(xe_ref.shape[1])

    def linear(h, l):
        # bias-free matmul (bias is exactly cancelled by the following
        # training-mode BatchNorm); bf16 operands, f32 accumulation.
        return jnp.dot(h.astype(jnp.bfloat16), w_ref[l],
                       preferred_element_type=jnp.float32)

    def linear_bias(h, l):
        return linear(h, l) + p_all[BIAS_OFF + l][None, :]

    def bn_relu(h, l, relu=True):
        # training-mode BatchNorm1d, biased batch variance via E[x^2]-E[x]^2
        # (two independent sublane reductions -> dual-issue on the XLUs).
        s1 = jnp.sum(h, axis=0, keepdims=True)
        s2 = jnp.sum(h * h, axis=0, keepdims=True)
        mean = s1 * inv_b
        var = s2 * inv_b - mean * mean
        scale = p_all[GAMMA_OFF + l][None, :] * jax.lax.rsqrt(var + BN_EPS)
        out = (h - mean) * scale + p_all[BETA_OFF + l][None, :]
        if relu:
            out = jnp.maximum(out, 0.0)
        return out

    x = xe_ref[0]                            # (B, D) f32
    eps = xe_ref[1]                          # (B, D) f32

    # ----- encode -----
    h = bn_relu(linear(x, 0), 0)             # linear1 + lin_bn1 + relu
    h = bn_relu(linear(h, 1), 1)             # linear2 + lin_bn2 + relu
    h = bn_relu(linear(h, 2), 2)             # linear3 + lin_bn3 + relu
    h = bn_relu(linear(h, 3), 3)             # fc1     + bn1     + relu
    mu = linear_bias(h, 4)                   # fc21 (bias kept)
    logvar = linear_bias(h, 5)               # fc22 (bias kept)
    out_ref[1] = mu
    out_ref[2] = logvar

    # ----- reparameterize (training mode) -----
    # Padded lanes of mu/logvar/eps are exactly zero, so z's padded lanes are
    # zero and feed zero weight rows downstream (no NaN/Inf risk from exp).
    z = mu + eps * jnp.exp(0.5 * logvar)

    # ----- decode -----
    h = bn_relu(linear(z, 6), 4)             # fc3     + fc_bn3 + relu
    h = bn_relu(linear(h, 7), 5)             # fc4     + fc_bn4 + relu
    h = bn_relu(linear(h, 8), 6)             # linear4 + lin_bn4 + relu
    h = bn_relu(linear(h, 9), 7)             # linear5 + lin_bn5 + relu
    out_ref[0] = bn_relu(linear(h, 10), 8, relu=False)   # linear6 + lin_bn6


# ----------------------------- wrapper -------------------------------------
@functools.lru_cache(maxsize=None)
def _build_forward(batch):
    vmem = pl.BlockSpec(memory_space=pltpu.MemorySpace.VMEM)
    call = pl.pallas_call(
        sb_vae_kernel,
        out_shape=jax.ShapeDtypeStruct((3, batch, D), jnp.float32),
        in_specs=[vmem, vmem, vmem],
        out_specs=vmem,
    )

    def fwd(xe, w, p):
        out = call(xe, w, p)
        # Un-pad inside the same executable -> one dispatch per forward call.
        return out[0, :, :DIM], out[1, :, :LAT], out[2, :, :LAT]

    return jax.jit(fwd)


def sb_vae_forward(x, eps, w_packed_bf16, p_packed):
    """x: (B, DIM) f32; eps: (B, LAT) f32. Returns (recon, mu, logvar)."""
    x = np.asarray(x, dtype=np.float32)
    eps = np.asarray(eps, dtype=np.float32)
    batch = x.shape[0]
    # Host-side pad + pack (once, outside jit: no extra device ops per call).
    xe = np.zeros((2, batch, D), np.float32)
    xe[0, :, :DIM] = x
    xe[1, :, :LAT] = eps
    return _build_forward(batch)(jnp.asarray(xe), w_packed_bf16, p_packed)


# ------------------------- deterministic init ------------------------------
def init_params(key):
    w_packed = np.zeros((N_LIN, D, D), np.float32)
    p_packed = np.zeros((N_PARAM_ROWS, D), np.float32)
    keys = jax.random.split(key, 2 * N_LIN)
    for l, (fan_in, fan_out) in enumerate(LINEAR_DIMS):
        bound = 1.0 / np.sqrt(float(fan_in))
        w = jax.random.uniform(keys[2 * l], (fan_in, fan_out),
                               minval=-bound, maxval=bound, dtype=jnp.float32)
        b = jax.random.uniform(keys[2 * l + 1], (fan_out,),
                               minval=-bound, maxval=bound, dtype=jnp.float32)
        w_packed[l, :fan_in, :fan_out] = np.asarray(w)   # stores W.T (in, out)
        p_packed[BIAS_OFF + l, :fan_out] = np.asarray(b)
    for l, f in enumerate(BN_DIMS):
        p_packed[GAMMA_OFF + l, :f] = 1.0                # BN init: gamma=1, beta=0
    # bf16 weights: halves the dominant DMA and feeds the MXU natively.
    return jnp.asarray(w_packed, dtype=jnp.bfloat16), jnp.asarray(p_packed)


# --------------------- plain-XLA reference (for checking) ------------------
def reference_forward(x, eps, w_packed_bf16, p_packed):
    """Textbook Linear + training-mode BatchNorm1d, mirrors PyTorch math."""
    w = w_packed_bf16
    p = p_packed
    batch = x.shape[0]
    xp = jnp.zeros((batch, D), jnp.float32).at[:, :DIM].set(x)
    ep = jnp.zeros((batch, D), jnp.float32).at[:, :LAT].set(eps)

    def linear(h, l):
        y = jnp.dot(h.astype(jnp.bfloat16), w[l],
                    preferred_element_type=jnp.float32)
        return y + p[BIAS_OFF + l][None, :]

    def bn_relu(h, l, relu=True):
        mean = jnp.mean(h, axis=0, keepdims=True)
        var = jnp.mean((h - mean) ** 2, axis=0, keepdims=True)   # biased var
        out = (h - mean) / jnp.sqrt(var + BN_EPS)
        out = out * p[GAMMA_OFF + l][None, :] + p[BETA_OFF + l][None, :]
        return jnp.maximum(out, 0.0) if relu else out

    h = bn_relu(linear(xp, 0), 0)
    h = bn_relu(linear(h, 1), 1)
    h = bn_relu(linear(h, 2), 2)
    h = bn_relu(linear(h, 3), 3)
    mu = linear(h, 4)
    logvar = linear(h, 5)
    z = mu + ep * jnp.exp(0.5 * logvar)
    h = bn_relu(linear(z, 6), 4)
    h = bn_relu(linear(h, 7), 5)
    h = bn_relu(linear(h, 8), 6)
    h = bn_relu(linear(h, 9), 7)
    recon = bn_relu(linear(h, 10), 8, relu=False)
    return recon[:, :DIM], mu[:, :LAT], logvar[:, :LAT]


if __name__ == "__main__":
    key = jax.random.PRNGKey(0)
    k_param, k_x, k_eps = jax.random.split(key, 3)

    w_packed_bf16, p_packed = init_params(k_param)

    x = jax.random.normal(k_x, (B, DIM), dtype=jnp.float32)
    eps = jax.random.normal(k_eps, (B, LAT), dtype=jnp.float32)

    recon, mu, logvar = sb_vae_forward(x, eps, w_packed_bf16, p_packed)
    jax.block_until_ready((recon, mu, logvar))

    assert recon.shape == (B, DIM)
    assert mu.shape == (B, LAT)
    assert logvar.shape == (B, LAT)

    # Correctness check against the plain-XLA reference.
    r_recon, r_mu, r_logvar = reference_forward(x, eps, w_packed_bf16, p_packed)
    np.testing.assert_allclose(np.asarray(recon), np.asarray(r_recon),
                               rtol=1e-2, atol=1e-2)
    np.testing.assert_allclose(np.asarray(mu), np.asarray(r_mu),
                               rtol=1e-2, atol=1e-2)
    np.testing.assert_allclose(np.asarray(logvar), np.asarray(r_logvar),
                               rtol=1e-2, atol=1e-2)

    print("KERNEL_OK")
</pallas_src>

<mosaic_0001>
module attributes {stable_mosaic.version = 11 : i64} {
  func.func @sb_vae_kernel(%arg0: memref<2x8x128xf32, #tpu.memory_space<vmem>>, %arg1: memref<11x128x128xbf16, #tpu.memory_space<vmem>>, %arg2: memref<29x128xf32, #tpu.memory_space<vmem>>, %arg3: memref<3x8x128xf32, #tpu.memory_space<vmem>>) attributes {dimension_semantics = [], scalar_prefetch = 0 : i64, scratch_operands = 0 : i64, tpu.core_type = #tpu.core_type<tc>} {
    %c0 = arith.constant 0 : index
    %c0_0 = arith.constant 0 : index
    %0 = vector.load %arg2[%c0, %c0_0] : memref<29x128xf32, #tpu.memory_space<vmem>>, vector<29x128xf32>
    %c0_1 = arith.constant 0 : index
    %c0_2 = arith.constant 0 : index
    %c0_3 = arith.constant 0 : index
    %1 = vector.load %arg0[%c0_1, %c0_2, %c0_3] : memref<2x8x128xf32, #tpu.memory_space<vmem>>, vector<1x8x128xf32>
    %2 = vector.shape_cast %1 : vector<1x8x128xf32> to vector<8x128xf32>
    %c1 = arith.constant 1 : index
    %c0_4 = arith.constant 0 : index
    %c0_5 = arith.constant 0 : index
    %3 = vector.load %arg0[%c1, %c0_4, %c0_5] : memref<2x8x128xf32, #tpu.memory_space<vmem>>, vector<1x8x128xf32>
    %4 = vector.shape_cast %3 : vector<1x8x128xf32> to vector<8x128xf32>
    %5 = arith.truncf %2 : vector<8x128xf32> to vector<8x128xbf16>
    %c0_6 = arith.constant 0 : index
    %c0_7 = arith.constant 0 : index
    %c0_8 = arith.constant 0 : index
    %6 = vector.load %arg1[%c0_6, %c0_7, %c0_8] : memref<11x128x128xbf16, #tpu.memory_space<vmem>>, vector<1x128x128xbf16>
    %7 = vector.shape_cast %6 : vector<1x128x128xbf16> to vector<128x128xbf16>
    %cst = arith.constant dense<0.000000e+00> : vector<8x128xf32>
    %8 = tpu.matmul %5, %7, %cst {dimension_numbers = #tpu.dot_dimension_numbers<[1], [0], [0], [1], [0, 0, 1, 1], [], []>} : vector<8x128xbf16>, vector<128x128xbf16>, vector<8x128xf32> -> vector<8x128xf32>
    %cst_9 = arith.constant dense<0.000000e+00> : vector<128xf32>
    %9 = vector.multi_reduction <add>, %8, %cst_9 [0] : vector<8x128xf32> to vector<128xf32>
    %10 = vector.shape_cast %9 : vector<128xf32> to vector<1x128xf32>
    %11 = arith.mulf %8, %8 : vector<8x128xf32>
    %cst_10 = arith.constant dense<0.000000e+00> : vector<128xf32>
    %12 = vector.multi_reduction <add>, %11, %cst_10 [0] : vector<8x128xf32> to vector<128xf32>
    %13 = vector.shape_cast %12 : vector<128xf32> to vector<1x128xf32>
    %cst_11 = arith.constant 1.250000e-01 : f32
    %14 = vector.broadcast %cst_11 : f32 to vector<1x128xf32>
    %15 = arith.mulf %10, %14 : vector<1x128xf32>
    %cst_12 = arith.constant 1.250000e-01 : f32
    %16 = vector.broadcast %cst_12 : f32 to vector<1x128xf32>
    %17 = arith.mulf %13, %16 : vector<1x128xf32>
    %18 = arith.mulf %15, %15 : vector<1x128xf32>
    %19 = arith.subf %17, %18 : vector<1x128xf32>
    %20 = vector.extract_strided_slice %0 {offsets = [11, 0], sizes = [1, 128], strides = [1, 1]} : vector<29x128xf32> to vector<1x128xf32>
    %21 = vector.shape_cast %20 : vector<1x128xf32> to vector<128xf32>
    %22 = vector.shape_cast %21 : vector<128xf32> to vector<1x128xf32>
    %cst_13 = arith.constant 9.99999974E-6 : f32
    %23 = vector.broadcast %cst_13 : f32 to vector<1x128xf32>
    %24 = arith.addf %19, %23 : vector<1x128xf32>
    %25 = math.rsqrt %24 : vector<1x128xf32>
    %26 = arith.mulf %22, %25 : vector<1x128xf32>
    %27 = vector.broadcast %15 : vector<1x128xf32> to vector<8x128xf32>
    %28 = arith.subf %8, %27 : vector<8x128xf32>
    %29 = vector.broadcast %26 : vector<1x128xf32> to vector<8x128xf32>
    %30 = arith.mulf %28, %29 : vector<8x128xf32>
    %31 = vector.extract_strided_slice %0 {offsets = [20, 0], sizes = [1, 128], strides = [1, 1]} : vector<29x128xf32> to vector<1x128xf32>
    %32 = vector.shape_cast %31 : vector<1x128xf32> to vector<128xf32>
    %33 = vector.shape_cast %32 : vector<128xf32> to vector<1x128xf32>
    %34 = vector.broadcast %33 : vector<1x128xf32> to vector<8x128xf32>
    %35 = arith.addf %30, %34 : vector<8x128xf32>
    %cst_14 = arith.constant 0.000000e+00 : f32
    %36 = vector.broadcast %cst_14 : f32 to vector<8x128xf32>
    %37 = arith.maximumf %35, %36 : vector<8x128xf32>
    %38 = arith.truncf %37 : vector<8x128xf32> to vector<8x128xbf16>
    %c1_15 = arith.constant 1 : index
    %c0_16 = arith.constant 0 : index
    %c0_17 = arith.constant 0 : index
    %39 = vector.load %arg1[%c1_15, %c0_16, %c0_17] : memref<11x128x128xbf16, #tpu.memory_space<vmem>>, vector<1x128x128xbf16>
    %40 = vector.shape_cast %39 : vector<1x128x128xbf16> to vector<128x128xbf16>
    %cst_18 = arith.constant dense<0.000000e+00> : vector<8x128xf32>
    %41 = tpu.matmul %38, %40, %cst_18 {dimension_numbers = #tpu.dot_dimension_numbers<[1], [0], [0], [1], [0, 0, 1, 1], [], []>} : vector<8x128xbf16>, vector<128x128xbf16>, vector<8x128xf32> -> vector<8x128xf32>
    %cst_19 = arith.constant dense<0.000000e+00> : vector<128xf32>
    %42 = vector.multi_reduction <add>, %41, %cst_19 [0] : vector<8x128xf32> to vector<128xf32>
    %43 = vector.shape_cast %42 : vector<128xf32> to vector<1x128xf32>
    %44 = arith.mulf %41, %41 : vector<8x128xf32>
    %cst_20 = arith.constant dense<0.000000e+00> : vector<128xf32>
    %45 = vector.multi_reduction <add>, %44, %cst_20 [0] : vector<8x128xf32> to vector<128xf32>
    %46 = vector.shape_cast %45 : vector<128xf32> to vector<1x128xf32>
    %cst_21 = arith.constant 1.250000e-01 : f32
    %47 = vector.broadcast %cst_21 : f32 to vector<1x128xf32>
    %48 = arith.mulf %43, %47 : vector<1x128xf32>
    %cst_22 = arith.constant 1.250000e-01 : f32
    %49 = vector.broadcast %cst_22 : f32 to vector<1x128xf32>
    %50 = arith.mulf %46, %49 : vector<1x128xf32>
    %51 = arith.mulf %48, %48 : vector<1x128xf32>
    %52 = arith.subf %50, %51 : vector<1x128xf32>
    %53 = vector.extract_strided_slice %0 {offsets = [12, 0], sizes = [1, 128], strides = [1, 1]} : vector<29x128xf32> to vector<1x128xf32>
    %54 = vector.shape_cast %53 : vector<1x128xf32> to vector<128xf32>
    %55 = vector.shape_cast %54 : vector<128xf32> to vector<1x128xf32>
    %cst_23 = arith.constant 9.99999974E-6 : f32
    %56 = vector.broadcast %cst_23 : f32 to vector<1x128xf32>
    %57 = arith.addf %52, %56 : vector<1x128xf32>
    %58 = math.rsqrt %57 : vector<1x128xf32>
    %59 = arith.mulf %55, %58 : vector<1x128xf32>
    %60 = vector.broadcast %48 : vector<1x128xf32> to vector<8x128xf32>
    %61 = arith.subf %41, %60 : vector<8x128xf32>
    %62 = vector.broadcast %59 : vector<1x128xf32> to vector<8x128xf32>
    %63 = arith.mulf %61, %62 : vector<8x128xf32>
    %64 = vector.extract_strided_slice %0 {offsets = [21, 0], sizes = [1, 128], strides = [1, 1]} : vector<29x128xf32> to vector<1x128xf32>
    %65 = vector.shape_cast %64 : vector<1x128xf32> to vector<128xf32>
    %66 = vector.shape_cast %65 : vector<128xf32> to vector<1x128xf32>
    %67 = vector.broadcast %66 : vector<1x128xf32> to vector<8x128xf32>
    %68 = arith.addf %63, %67 : vector<8x128xf32>
    %cst_24 = arith.constant 0.000000e+00 : f32
    %69 = vector.broadcast %cst_24 : f32 to vector<8x128xf32>
    %70 = arith.maximumf %68, %69 : vector<8x128xf32>
    %71 = arith.truncf %70 : vector<8x128xf32> to vector<8x128xbf16>
    %c2 = arith.constant 2 : index
    %c0_25 = arith.constant 0 : index
    %c0_26 = arith.constant 0 : index
    %72 = vector.load %arg1[%c2, %c0_25, %c0_26] : memref<11x128x128xbf16, #tpu.memory_space<vmem>>, vector<1x128x128xbf16>
    %73 = vector.shape_cast %72 : vector<1x128x128xbf16> to vector<128x128xbf16>
    %cst_27 = arith.constant dense<0.000000e+00> : vector<8x128xf32>
    %74 = tpu.matmul %71, %73, %cst_27 {dimension_numbers = #tpu.dot_dimension_numbers<[1], [0], [0], [1], [0, 0, 1, 1], [], []>} : vector<8x128xbf16>, vector<128x128xbf16>, vector<8x128xf32> -> vector<8x128xf32>
    %cst_28 = arith.constant dense<0.000000e+00> : vector<128xf32>
    %75 = vector.multi_reduction <add>, %74, %cst_28 [0] : vector<8x128xf32> to vector<128xf32>
    %76 = vector.shape_cast %75 : vector<128xf32> to vector<1x128xf32>
    %77 = arith.mulf %74, %74 : vector<8x128xf32>
    %cst_29 = arith.constant dense<0.000000e+00> : vector<128xf32>
    %78 = vector.multi_reduction <add>, %77, %cst_29 [0] : vector<8x128xf32> to vector<128xf32>
    %79 = vector.shape_cast %78 : vector<128xf32> to vector<1x128xf32>
    %cst_30 = arith.constant 1.250000e-01 : f32
    %80 = vector.broadcast %cst_30 : f32 to vector<1x128xf32>
    %81 = arith.mulf %76, %80 : vector<1x128xf32>
    %cst_31 = arith.constant 1.250000e-01 : f32
    %82 = vector.broadcast %cst_31 : f32 to vector<1x128xf32>
    %83 = arith.mulf %79, %82 : vector<1x128xf32>
    %84 = arith.mulf %81, %81 : vector<1x128xf32>
    %85 = arith.subf %83, %84 : vector<1x128xf32>
    %86 = vector.extract_strided_slice %0 {offsets = [13, 0], sizes = [1, 128], strides = [1, 1]} : vector<29x128xf32> to vector<1x128xf32>
    %87 = vector.shape_cast %86 : vector<1x128xf32> to vector<128xf32>
    %88 = vector.shape_cast %87 : vector<128xf32> to vector<1x128xf32>
    %cst_32 = arith.constant 9.99999974E-6 : f32
    %89 = vector.broadcast %cst_32 : f32 to vector<1x128xf32>
    %90 = arith.addf %85, %89 : vector<1x128xf32>
    %91 = math.rsqrt %90 : vector<1x128xf32>
    %92 = arith.mulf %88, %91 : vector<1x128xf32>
    %93 = vector.broadcast %81 : vector<1x128xf32> to vector<8x128xf32>
    %94 = arith.subf %74, %93 : vector<8x128xf32>
    %95 = vector.broadcast %92 : vector<1x128xf32> to vector<8x128xf32>
    %96 = arith.mulf %94, %95 : vector<8x128xf32>
    %97 = vector.extract_strided_slice %0 {offsets = [22, 0], sizes = [1, 128], strides = [1, 1]} : vector<29x128xf32> to vector<1x128xf32>
    %98 = vector.shape_cast %97 : vector<1x128xf32> to vector<128xf32>
    %99 = vector.shape_cast %98 : vector<128xf32> to vector<1x128xf32>
    %100 = vector.broadcast %99 : vector<1x128xf32> to vector<8x128xf32>
    %101 = arith.addf %96, %100 : vector<8x128xf32>
    %cst_33 = arith.constant 0.000000e+00 : f32
    %102 = vector.broadcast %cst_33 : f32 to vector<8x128xf32>
    %103 = arith.maximumf %101, %102 : vector<8x128xf32>
    %104 = arith.truncf %103 : vector<8x128xf32> to vector<8x128xbf16>
    %c3 = arith.constant 3 : index
    %c0_34 = arith.constant 0 : index
    %c0_35 = arith.constant 0 : index
    %105 = vector.load %arg1[%c3, %c0_34, %c0_35] : memref<11x128x128xbf16, #tpu.memory_space<vmem>>, vector<1x128x128xbf16>
    %106 = vector.shape_cast %105 : vector<1x128x128xbf16> to vector<128x128xbf16>
    %cst_36 = arith.constant dense<0.000000e+00> : vector<8x128xf32>
    %107 = tpu.matmul %104, %106, %cst_36 {dimension_numbers = #tpu.dot_dimension_numbers<[1], [0], [0], [1], [0, 0, 1, 1], [], []>} : vector<8x128xbf16>, vector<128x128xbf16>, vector<8x128xf32> -> vector<8x128xf32>
    %cst_37 = arith.constant dense<0.000000e+00> : vector<128xf32>
    %108 = vector.multi_reduction <add>, %107, %cst_37 [0] : vector<8x128xf32> to vector<128xf32>
    %109 = vector.shape_cast %108 : vector<128xf32> to vector<1x128xf32>
    %110 = arith.mulf %107, %107 : vector<8x128xf32>
    %cst_38 = arith.constant dense<0.000000e+00> : vector<128xf32>
    %111 = vector.multi_reduction <add>, %110, %cst_38 [0] : vector<8x128xf32> to vector<128xf32>
    %112 = vector.shape_cast %111 : vector<128xf32> to vector<1x128xf32>
    %cst_39 = arith.constant 1.250000e-01 : f32
    %113 = vector.broadcast %cst_39 : f32 to vector<1x128xf32>
    %114 = arith.mulf %109, %113 : vector<1x128xf32>
    %cst_40 = arith.constant 1.250000e-01 : f32
    %115 = vector.broadcast %cst_40 : f32 to vector<1x128xf32>
    %116 = arith.mulf %112, %115 : vector<1x128xf32>
    %117 = arith.mulf %114, %114 : vector<1x128xf32>
    %118 = arith.subf %116, %117 : vector<1x128xf32>
    %119 = vector.extract_strided_slice %0 {offsets = [14, 0], sizes = [1, 128], strides = [1, 1]} : vector<29x128xf32> to vector<1x128xf32>
    %120 = vector.shape_cast %119 : vector<1x128xf32> to vector<128xf32>
    %121 = vector.shape_cast %120 : vector<128xf32> to vector<1x128xf32>
    %cst_41 = arith.constant 9.99999974E-6 : f32
    %122 = vector.broadcast %cst_41 : f32 to vector<1x128xf32>
    %123 = arith.addf %118, %122 : vector<1x128xf32>
    %124 = math.rsqrt %123 : vector<1x128xf32>
    %125 = arith.mulf %121, %124 : vector<1x128xf32>
    %126 = vector.broadcast %114 : vector<1x128xf32> to vector<8x128xf32>
    %127 = arith.subf %107, %126 : vector<8x128xf32>
    %128 = vector.broadcast %125 : vector<1x128xf32> to vector<8x128xf32>
    %129 = arith.mulf %127, %128 : vector<8x128xf32>
    %130 = vector.extract_strided_slice %0 {offsets = [23, 0], sizes = [1, 128], strides = [1, 1]} : vector<29x128xf32> to vector<1x128xf32>
    %131 = vector.shape_cast %130 : vector<1x128xf32> to vector<128xf32>
    %132 = vector.shape_cast %131 : vector<128xf32> to vector<1x128xf32>
    %133 = vector.broadcast %132 : vector<1x128xf32> to vector<8x128xf32>
    %134 = arith.addf %129, %133 : vector<8x128xf32>
    %cst_42 = arith.constant 0.000000e+00 : f32
    %135 = vector.broadcast %cst_42 : f32 to vector<8x128xf32>
    %136 = arith.maximumf %134, %135 : vector<8x128xf32>
    %137 = arith.truncf %136 : vector<8x128xf32> to vector<8x128xbf16>
    %c4 = arith.constant 4 : index
    %c0_43 = arith.constant 0 : index
    %c0_44 = arith.constant 0 : index
    %138 = vector.load %arg1[%c4, %c0_43, %c0_44] : memref<11x128x128xbf16, #tpu.memory_space<vmem>>, vector<1x128x128xbf16>
    %139 = vector.shape_cast %138 : vector<1x128x128xbf16> to vector<128x128xbf16>
    %cst_45 = arith.constant dense<0.000000e+00> : vector<8x128xf32>
    %140 = tpu.matmul %137, %139, %cst_45 {dimension_numbers = #tpu.dot_dimension_numbers<[1], [0], [0], [1], [0, 0, 1, 1], [], []>} : vector<8x128xbf16>, vector<128x128xbf16>, vector<8x128xf32> -> vector<8x128xf32>
    %141 = vector.extract_strided_slice %0 {offsets = [4, 0], sizes = [1, 128], strides = [1, 1]} : vector<29x128xf32> to vector<1x128xf32>
    %142 = vector.shape_cast %141 : vector<1x128xf32> to vector<128xf32>
    %143 = vector.shape_cast %142 : vector<128xf32> to vector<1x128xf32>
    %144 = vector.broadcast %143 : vector<1x128xf32> to vector<8x128xf32>
    %145 = arith.addf %140, %144 : vector<8x128xf32>
    %146 = arith.truncf %136 : vector<8x128xf32> to vector<8x128xbf16>
    %c5 = arith.constant 5 : index
    %c0_46 = arith.constant 0 : index
    %c0_47 = arith.constant 0 : index
    %147 = vector.load %arg1[%c5, %c0_46, %c0_47] : memref<11x128x128xbf16, #tpu.memory_space<vmem>>, vector<1x128x128xbf16>
    %148 = vector.shape_cast %147 : vector<1x128x128xbf16> to vector<128x128xbf16>
    %cst_48 = arith.constant dense<0.000000e+00> : vector<8x128xf32>
    %149 = tpu.matmul %146, %148, %cst_48 {dimension_numbers = #tpu.dot_dimension_numbers<[1], [0], [0], [1], [0, 0, 1, 1], [], []>} : vector<8x128xbf16>, vector<128x128xbf16>, vector<8x128xf32> -> vector<8x128xf32>
    %150 = vector.extract_strided_slice %0 {offsets = [5, 0], sizes = [1, 128], strides = [1, 1]} : vector<29x128xf32> to vector<1x128xf32>
    %151 = vector.shape_cast %150 : vector<1x128xf32> to vector<128xf32>
    %152 = vector.shape_cast %151 : vector<128xf32> to vector<1x128xf32>
    %153 = vector.broadcast %152 : vector<1x128xf32> to vector<8x128xf32>
    %154 = arith.addf %149, %153 : vector<8x128xf32>
    %c1_49 = arith.constant 1 : index
    %c0_50 = arith.constant 0 : index
    %c0_51 = arith.constant 0 : index
    %155 = vector.load %arg3[%c1_49, %c0_50, %c0_51] : memref<3x8x128xf32, #tpu.memory_space<vmem>>, vector<1x8x128xf32>
    %156 = vector.shape_cast %155 : vector<1x8x128xf32> to vector<8x128xf32>
    %157 = vector.shape_cast %145 : vector<8x128xf32> to vector<1x8x128xf32>
    tpu.vector_store %arg3[%c1_49, %c0_50, %c0_51], %157 {strides = array<i32>} : memref<3x8x128xf32, #tpu.memory_space<vmem>>, vector<1x8x128xf32>,
    %c2_52 = arith.constant 2 : index
    %c0_53 = arith.constant 0 : index
    %c0_54 = arith.constant 0 : index
    %158 = vector.load %arg3[%c2_52, %c0_53, %c0_54] : memref<3x8x128xf32, #tpu.memory_space<vmem>>, vector<1x8x128xf32>
    %159 = vector.shape_cast %158 : vector<1x8x128xf32> to vector<8x128xf32>
    %160 = vector.shape_cast %154 : vector<8x128xf32> to vector<1x8x128xf32>
    tpu.vector_store %arg3[%c2_52, %c0_53, %c0_54], %160 {strides = array<i32>} : memref<3x8x128xf32, #tpu.memory_space<vmem>>, vector<1x8x128xf32>,
    %cst_55 = arith.constant 5.000000e-01 : f32
    %161 = vector.broadcast %cst_55 : f32 to vector<8x128xf32>
    %162 = arith.mulf %161, %154 : vector<8x128xf32>
    %163 = math.exp %162 : vector<8x128xf32>
    %164 = arith.mulf %4, %163 : vector<8x128xf32>
    %165 = arith.addf %145, %164 : vector<8x128xf32>
    %166 = arith.truncf %165 : vector<8x128xf32> to vector<8x128xbf16>
    %c6 = arith.constant 6 : index
    %c0_56 = arith.constant 0 : index
    %c0_57 = arith.constant 0 : index
    %167 = vector.load %arg1[%c6, %c0_56, %c0_57] : memref<11x128x128xbf16, #tpu.memory_space<vmem>>, vector<1x128x128xbf16>
    %168 = vector.shape_cast %167 : vector<1x128x128xbf16> to vector<128x128xbf16>
    %cst_58 = arith.constant dense<0.000000e+00> : vector<8x128xf32>
    %169 = tpu.matmul %166, %168, %cst_58 {dimension_numbers = #tpu.dot_dimension_numbers<[1], [0], [0], [1], [0, 0, 1, 1], [], []>} : vector<8x128xbf16>, vector<128x128xbf16>, vector<8x128xf32> -> vector<8x128xf32>
    %cst_59 = arith.constant dense<0.000000e+00> : vector<128xf32>
    %170 = vector.multi_reduction <add>, %169, %cst_59 [0] : vector<8x128xf32> to vector<128xf32>
    %171 = vector.shape_cast %170 : vector<128xf32> to vector<1x128xf32>
    %172 = arith.mulf %169, %169 : vector<8x128xf32>
    %cst_60 = arith.constant dense<0.000000e+00> : vector<128xf32>
    %173 = vector.multi_reduction <add>, %172, %cst_60 [0] : vector<8x128xf32> to vector<128xf32>
    %174 = vector.shape_cast %173 : vector<128xf32> to vector<1x128xf32>
    %cst_61 = arith.constant 1.250000e-01 : f32
    %175 = vector.broadcast %cst_61 : f32 to vector<1x128xf32>
    %176 = arith.mulf %171, %175 : vector<1x128xf32>
    %cst_62 = arith.constant 1.250000e-01 : f32
    %177 = vector.broadcast %cst_62 : f32 to vector<1x128xf32>
    %178 = arith.mulf %174, %177 : vector<1x128xf32>
    %179 = arith.mulf %176, %176 : vector<1x128xf32>
    %180 = arith.subf %178, %179 : vector<1x128xf32>
    %181 = vector.extract_strided_slice %0 {offsets = [15, 0], sizes = [1, 128], strides = [1, 1]} : vector<29x128xf32> to vector<1x128xf32>
    %182 = vector.shape_cast %181 : vector<1x128xf32> to vector<128xf32>
    %183 = vector.shape_cast %182 : vector<128xf32> to vector<1x128xf32>
    %cst_63 = arith.constant 9.99999974E-6 : f32
    %184 = vector.broadcast %cst_63 : f32 to vector<1x128xf32>
    %185 = arith.addf %180, %184 : vector<1x128xf32>
    %186 = math.rsqrt %185 : vector<1x128xf32>
    %187 = arith.mulf %183, %186 : vector<1x128xf32>
    %188 = vector.broadcast %176 : vector<1x128xf32> to vector<8x128xf32>
    %189 = arith.subf %169, %188 : vector<8x128xf32>
    %190 = vector.broadcast %187 : vector<1x128xf32> to vector<8x128xf32>
    %191 = arith.mulf %189, %190 : vector<8x128xf32>
    %192 = vector.extract_strided_slice %0 {offsets = [24, 0], sizes = [1, 128], strides = [1, 1]} : vector<29x128xf32> to vector<1x128xf32>
    %193 = vector.shape_cast %192 : vector<1x128xf32> to vector<128xf32>
    %194 = vector.shape_cast %193 : vector<128xf32> to vector<1x128xf32>
    %195 = vector.broadcast %194 : vector<1x128xf32> to vector<8x128xf32>
    %196 = arith.addf %191, %195 : vector<8x128xf32>
    %cst_64 = arith.constant 0.000000e+00 : f32
    %197 = vector.broadcast %cst_64 : f32 to vector<8x128xf32>
    %198 = arith.maximumf %196, %197 : vector<8x128xf32>
    %199 = arith.truncf %198 : vector<8x128xf32> to vector<8x128xbf16>
    %c7 = arith.constant 7 : index
    %c0_65 = arith.constant 0 : index
    %c0_66 = arith.constant 0 : index
    %200 = vector.load %arg1[%c7, %c0_65, %c0_66] : memref<11x128x128xbf16, #tpu.memory_space<vmem>>, vector<1x128x128xbf16>
    %201 = vector.shape_cast %200 : vector<1x128x128xbf16> to vector<128x128xbf16>
    %cst_67 = arith.constant dense<0.000000e+00> : vector<8x128xf32>
    %202 = tpu.matmul %199, %201, %cst_67 {dimension_numbers = #tpu.dot_dimension_numbers<[1], [0], [0], [1], [0, 0, 1, 1], [], []>} : vector<8x128xbf16>, vector<128x128xbf16>, vector<8x128xf32> -> vector<8x128xf32>
    %cst_68 = arith.constant dense<0.000000e+00> : vector<128xf32>
    %203 = vector.multi_reduction <add>, %202, %cst_68 [0] : vector<8x128xf32> to vector<128xf32>
    %204 = vector.shape_cast %203 : vector<128xf32> to vector<1x128xf32>
    %205 = arith.mulf %202, %202 : vector<8x128xf32>
    %cst_69 = arith.constant dense<0.000000e+00> : vector<128xf32>
    %206 = vector.multi_reduction <add>, %205, %cst_69 [0] : vector<8x128xf32> to vector<128xf32>
    %207 = vector.shape_cast %206 : vector<128xf32> to vector<1x128xf32>
    %cst_70 = arith.constant 1.250000e-01 : f32
    %208 = vector.broadcast %cst_70 : f32 to vector<1x128xf32>
    %209 = arith.mulf %204, %208 : vector<1x128xf32>
    %cst_71 = arith.constant 1.250000e-01 : f32
    %210 = vector.broadcast %cst_71 : f32 to vector<1x128xf32>
    %211 = arith.mulf %207, %210 : vector<1x128xf32>
    %212 = arith.mulf %209, %209 : vector<1x128xf32>
    %213 = arith.subf %211, %212 : vector<1x128xf32>
    %214 = vector.extract_strided_slice %0 {offsets = [16, 0], sizes = [1, 128], strides = [1, 1]} : vector<29x128xf32> to vector<1x128xf32>
    %215 = vector.shape_cast %214 : vector<1x128xf32> to vector<128xf32>
    %216 = vector.shape_cast %215 : vector<128xf32> to vector<1x128xf32>
    %cst_72 = arith.constant 9.99999974E-6 : f32
    %217 = vector.broadcast %cst_72 : f32 to vector<1x128xf32>
    %218 = arith.addf %213, %217 : vector<1x128xf32>
    %219 = math.rsqrt %218 : vector<1x128xf32>
    %220 = arith.mulf %216, %219 : vector<1x128xf32>
    %221 = vector.broadcast %209 : vector<1x128xf32> to vector<8x128xf32>
    %222 = arith.subf %202, %221 : vector<8x128xf32>
    %223 = vector.broadcast %220 : vector<1x128xf32> to vector<8x128xf32>
    %224 = arith.mulf %222, %223 : vector<8x128xf32>
    %225 = vector.extract_strided_slice %0 {offsets = [25, 0], sizes = [1, 128], strides = [1, 1]} : vector<29x128xf32> to vector<1x128xf32>
    %226 = vector.shape_cast %225 : vector<1x128xf32> to vector<128xf32>
    %227 = vector.shape_cast %226 : vector<128xf32> to vector<1x128xf32>
    %228 = vector.broadcast %227 : vector<1x128xf32> to vector<8x128xf32>
    %229 = arith.addf %224, %228 : vector<8x128xf32>
    %cst_73 = arith.constant 0.000000e+00 : f32
    %230 = vector.broadcast %cst_73 : f32 to vector<8x128xf32>
    %231 = arith.maximumf %229, %230 : vector<8x128xf32>
    %232 = arith.truncf %231 : vector<8x128xf32> to vector<8x128xbf16>
    %c8 = arith.constant 8 : index
    %c0_74 = arith.constant 0 : index
    %c0_75 = arith.constant 0 : index
    %233 = vector.load %arg1[%c8, %c0_74, %c0_75] : memref<11x128x128xbf16, #tpu.memory_space<vmem>>, vector<1x128x128xbf16>
    %234 = vector.shape_cast %233 : vector<1x128x128xbf16> to vector<128x128xbf16>
    %cst_76 = arith.constant dense<0.000000e+00> : vector<8x128xf32>
    %235 = tpu.matmul %232, %234, %cst_76 {dimension_numbers = #tpu.dot_dimension_numbers<[1], [0], [0], [1], [0, 0, 1, 1], [], []>} : vector<8x128xbf16>, vector<128x128xbf16>, vector<8x128xf32> -> vector<8x128xf32>
    %cst_77 = arith.constant dense<0.000000e+00> : vector<128xf32>
    %236 = vector.multi_reduction <add>, %235, %cst_77 [0] : vector<8x128xf32> to vector<128xf32>
    %237 = vector.shape_cast %236 : vector<128xf32> to vector<1x128xf32>
    %238 = arith.mulf %235, %235 : vector<8x128xf32>
    %cst_78 = arith.constant dense<0.000000e+00> : vector<128xf32>
    %239 = vector.multi_reduction <add>, %238, %cst_78 [0] : vector<8x128xf32> to vector<128xf32>
    %240 = vector.shape_cast %239 : vector<128xf32> to vector<1x128xf32>
    %cst_79 = arith.constant 1.250000e-01 : f32
    %241 = vector.broadcast %cst_79 : f32 to vector<1x128xf32>
    %242 = arith.mulf %237, %241 : vector<1x128xf32>
    %cst_80 = arith.constant 1.250000e-01 : f32
    %243 = vector.broadcast %cst_80 : f32 to vector<1x128xf32>
    %244 = arith.mulf %240, %243 : vector<1x128xf32>
    %245 = arith.mulf %242, %242 : vector<1x128xf32>
    %246 = arith.subf %244, %245 : vector<1x128xf32>
    %247 = vector.extract_strided_slice %0 {offsets = [17, 0], sizes = [1, 128], strides = [1, 1]} : vector<29x128xf32> to vector<1x128xf32>
    %248 = vector.shape_cast %247 : vector<1x128xf32> to vector<128xf32>
    %249 = vector.shape_cast %248 : vector<128xf32> to vector<1x128xf32>
    %cst_81 = arith.constant 9.99999974E-6 : f32
    %250 = vector.broadcast %cst_81 : f32 to vector<1x128xf32>
    %251 = arith.addf %246, %250 : vector<1x128xf32>
    %252 = math.rsqrt %251 : vector<1x128xf32>
    %253 = arith.mulf %249, %252 : vector<1x128xf32>
    %254 = vector.broadcast %242 : vector<1x128xf32> to vector<8x128xf32>
    %255 = arith.subf %235, %254 : vector<8x128xf32>
    %256 = vector.broadcast %253 : vector<1x128xf32> to vector<8x128xf32>
    %257 = arith.mulf %255, %256 : vector<8x128xf32>
    %258 = vector.extract_strided_slice %0 {offsets = [26, 0], sizes = [1, 128], strides = [1, 1]} : vector<29x128xf32> to vector<1x128xf32>
    %259 = vector.shape_cast %258 : vector<1x128xf32> to vector<128xf32>
    %260 = vector.shape_cast %259 : vector<128xf32> to vector<1x128xf32>
    %261 = vector.broadcast %260 : vector<1x128xf32> to vector<8x128xf32>
    %262 = arith.addf %257, %261 : vector<8x128xf32>
    %cst_82 = arith.constant 0.000000e+00 : f32
    %263 = vector.broadcast %cst_82 : f32 to vector<8x128xf32>
    %264 = arith.maximumf %262, %263 : vector<8x128xf32>
    %265 = arith.truncf %264 : vector<8x128xf32> to vector<8x128xbf16>
    %c9 = arith.constant 9 : index
    %c0_83 = arith.constant 0 : index
    %c0_84 = arith.constant 0 : index
    %266 = vector.load %arg1[%c9, %c0_83, %c0_84] : memref<11x128x128xbf16, #tpu.memory_space<vmem>>, vector<1x128x128xbf16>
    %267 = vector.shape_cast %266 : vector<1x128x128xbf16> to vector<128x128xbf16>
    %cst_85 = arith.constant dense<0.000000e+00> : vector<8x128xf32>
    %268 = tpu.matmul %265, %267, %cst_85 {dimension_numbers = #tpu.dot_dimension_numbers<[1], [0], [0], [1], [0, 0, 1, 1], [], []>} : vector<8x128xbf16>, vector<128x128xbf16>, vector<8x128xf32> -> vector<8x128xf32>
    %cst_86 = arith.constant dense<0.000000e+00> : vector<128xf32>
    %269 = vector.multi_reduction <add>, %268, %cst_86 [0] : vector<8x128xf32> to vector<128xf32>
    %270 = vector.shape_cast %269 : vector<128xf32> to vector<1x128xf32>
    %271 = arith.mulf %268, %268 : vector<8x128xf32>
    %cst_87 = arith.constant dense<0.000000e+00> : vector<128xf32>
    %272 = vector.multi_reduction <add>, %271, %cst_87 [0] : vector<8x128xf32> to vector<128xf32>
    %273 = vector.shape_cast %272 : vector<128xf32> to vector<1x128xf32>
    %cst_88 = arith.constant 1.250000e-01 : f32
    %274 = vector.broadcast %cst_88 : f32 to vector<1x128xf32>
    %275 = arith.mulf %270, %274 : vector<1x128xf32>
    %cst_89 = arith.constant 1.250000e-01 : f32
    %276 = vector.broadcast %cst_89 : f32 to vector<1x128xf32>
    %277 = arith.mulf %273, %276 : vector<1x128xf32>
    %278 = arith.mulf %275, %275 : vector<1x128xf32>
    %279 = arith.subf %277, %278 : vector<1x128xf32>
    %280 = vector.extract_strided_slice %0 {offsets = [18, 0], sizes = [1, 128], strides = [1, 1]} : vector<29x128xf32> to vector<1x128xf32>
    %281 = vector.shape_cast %280 : vector<1x128xf32> to vector<128xf32>
    %282 = vector.shape_cast %281 : vector<128xf32> to vector<1x128xf32>
    %cst_90 = arith.constant 9.99999974E-6 : f32
    %283 = vector.broadcast %cst_90 : f32 to vector<1x128xf32>
    %284 = arith.addf %279, %283 : vector<1x128xf32>
    %285 = math.rsqrt %284 : vector<1x128xf32>
    %286 = arith.mulf %282, %285 : vector<1x128xf32>
    %287 = vector.broadcast %275 : vector<1x128xf32> to vector<8x128xf32>
    %288 = arith.subf %268, %287 : vector<8x128xf32>
    %289 = vector.broadcast %286 : vector<1x128xf32> to vector<8x128xf32>
    %290 = arith.mulf %288, %289 : vector<8x128xf32>
    %291 = vector.extract_strided_slice %0 {offsets = [27, 0], sizes = [1, 128], strides = [1, 1]} : vector<29x128xf32> to vector<1x128xf32>
    %292 = vector.shape_cast %291 : vector<1x128xf32> to vector<128xf32>
    %293 = vector.shape_cast %292 : vector<128xf32> to vector<1x128xf32>
    %294 = vector.broadcast %293 : vector<1x128xf32> to vector<8x128xf32>
    %295 = arith.addf %290, %294 : vector<8x128xf32>
    %cst_91 = arith.constant 0.000000e+00 : f32
    %296 = vector.broadcast %cst_91 : f32 to vector<8x128xf32>
    %297 = arith.maximumf %295, %296 : vector<8x128xf32>
    %298 = arith.truncf %297 : vector<8x128xf32> to vector<8x128xbf16>
    %c10 = arith.constant 10 : index
    %c0_92 = arith.constant 0 : index
    %c0_93 = arith.constant 0 : index
    %299 = vector.load %arg1[%c10, %c0_92, %c0_93] : memref<11x128x128xbf16, #tpu.memory_space<vmem>>, vector<1x128x128xbf16>
    %300 = vector.shape_cast %299 : vector<1x128x128xbf16> to vector<128x128xbf16>
    %cst_94 = arith.constant dense<0.000000e+00> : vector<8x128xf32>
    %301 = tpu.matmul %298, %300, %cst_94 {dimension_numbers = #tpu.dot_dimension_numbers<[1], [0], [0], [1], [0, 0, 1, 1], [], []>} : vector<8x128xbf16>, vector<128x128xbf16>, vector<8x128xf32> -> vector<8x128xf32>
    %cst_95 = arith.constant dense<0.000000e+00> : vector<128xf32>
    %302 = vector.multi_reduction <add>, %301, %cst_95 [0] : vector<8x128xf32> to vector<128xf32>
    %303 = vector.shape_cast %302 : vector<128xf32> to vector<1x128xf32>
    %304 = arith.mulf %301, %301 : vector<8x128xf32>
    %cst_96 = arith.constant dense<0.000000e+00> : vector<128xf32>
    %305 = vector.multi_reduction <add>, %304, %cst_96 [0] : vector<8x128xf32> to vector<128xf32>
    %306 = vector.shape_cast %305 : vector<128xf32> to vector<1x128xf32>
    %cst_97 = arith.constant 1.250000e-01 : f32
    %307 = vector.broadcast %cst_97 : f32 to vector<1x128xf32>
    %308 = arith.mulf %303, %307 : vector<1x128xf32>
    %cst_98 = arith.constant 1.250000e-01 : f32
    %309 = vector.broadcast %cst_98 : f32 to vector<1x128xf32>
    %310 = arith.mulf %306, %309 : vector<1x128xf32>
    %311 = arith.mulf %308, %308 : vector<1x128xf32>
    %312 = arith.subf %310, %311 : vector<1x128xf32>
    %313 = vector.extract_strided_slice %0 {offsets = [19, 0], sizes = [1, 128], strides = [1, 1]} : vector<29x128xf32> to vector<1x128xf32>
    %314 = vector.shape_cast %313 : vector<1x128xf32> to vector<128xf32>
    %315 = vector.shape_cast %314 : vector<128xf32> to vector<1x128xf32>
    %cst_99 = arith.constant 9.99999974E-6 : f32
    %316 = vector.broadcast %cst_99 : f32 to vector<1x128xf32>
    %317 = arith.addf %312, %316 : vector<1x128xf32>
    %318 = math.rsqrt %317 : vector<1x128xf32>
    %319 = arith.mulf %315, %318 : vector<1x128xf32>
    %320 = vector.broadcast %308 : vector<1x128xf32> to vector<8x128xf32>
    %321 = arith.subf %301, %320 : vector<8x128xf32>
    %322 = vector.broadcast %319 : vector<1x128xf32> to vector<8x128xf32>
    %323 = arith.mulf %321, %322 : vector<8x128xf32>
    %324 = vector.extract_strided_slice %0 {offsets = [28, 0], sizes = [1, 128], strides = [1, 1]} : vector<29x128xf32> to vector<1x128xf32>
    %325 = vector.shape_cast %324 : vector<1x128xf32> to vector<128xf32>
    %326 = vector.shape_cast %325 : vector<128xf32> to vector<1x128xf32>
    %327 = vector.broadcast %326 : vector<1x128xf32> to vector<8x128xf32>
    %328 = arith.addf %323, %327 : vector<8x128xf32>
    %c0_100 = arith.constant 0 : index
    %c0_101 = arith.constant 0 : index
    %c0_102 = arith.constant 0 : index
    %329 = vector.load %arg3[%c0_100, %c0_101, %c0_102] : memref<3x8x128xf32, #tpu.memory_space<vmem>>, vector<1x8x128xf32>
    %330 = vector.shape_cast %329 : vector<1x8x128xf32> to vector<8x128xf32>
    %331 = vector.shape_cast %328 : vector<8x128xf32> to vector<1x8x128xf32>
    tpu.vector_store %arg3[%c0_100, %c0_101, %c0_102], %331 {strides = array<i32>} : memref<3x8x128xf32, #tpu.memory_space<vmem>>, vector<1x8x128xf32>,
    return
  }
}

</mosaic_0001>

<bundles_post_ra>
// kernel: fwd.1
= control target key start
LH: loop header
LB: loop body
LE: loop exit
PB: predicated region body
PF: predicated region fallthrough
CT: control target
= control target key end

     0   :  { %8 = vsyncpa [#allocation3], 0  ;;  %s2380_s0 = inlined_call_operand.hbm [shape: f32[2,8,128], index: 0, kind: input, shape index: {}]   ;;  %s2381_s1 = inlined_call_operand.hbm [shape: bf16[11,128,128], index: 1, kind: input, shape index: {}]   ;;  %s2382_s2 = inlined_call_operand.hbm [shape: f32[29,128], index: 2, kind: input, shape index: {}]   ;;  %s2383_s3 = inlined_call_operand.vmem [shape: f32[3,8,128], index: 3, kind: output, shape index: {}]  }
   0x1   :  { %9 = vsyncpa [#allocation5], 0  ;;  %s2135_s12 = smov [#allocation4]   ;;  %s2065_s16 = scalar_lea.hbm %s2381_s1, 11264 }
   0x2   :  { %s27_s13 = sshll.u32 %s2135_s12, 4  ;;  %p2066_p0 = scmp.ne.s32.totalorder %s2381_s1, %s2065_s16  ;;  %s28_s13 = int_to_ptr.vmem [resolvable:$true] %s27_s13 }
   0x3   :  { %p2069_p1 = scmp.lt.u32.totalorder %s2065_s16, %s2381_s1 }
   0x5   :  { %p2071_p2 = pnand %p2069_p1, %p2066_p0 }
   0x7   :  { %2074 = shalt.err (!%p2071_p2)
}
   0x8   :  { %s2075_s21 = scalar_lea.vmem %s28_s13, 11264  ;;  %p2080_p4 = scmp.lt.s32.totalorder %s28_s13, %s28_s13 }
   0x9   :  { %p2076_p3 = scmp.ne.s32.totalorder %s28_s13, %s2075_s21  ;;  %p2081_p5 = scmp.lt.s32.totalorder %s2075_s21, %s2075_s21 }
   0xb   :  { %p2082_p6 = por %p2081_p5, %p2080_p4 }
   0xd   :  { %p2083_p7 = pnand %p2082_p6, %p2076_p3 }
   0xf   :  { %2086 = shalt.err (!%p2083_p7)
}
  0x10   :  { %s2136_s22 = smov 64   ;;  %s2137_s23 = smov 4  }
  0x11   :  { %33 = dma.hbm_to_vmem [thread:$0]  %s2381_s1, 11264, %s28_s13, [#allocation5], %s2136_s22, %s2136_s22, %s2137_s23  }
  0x12   :  { %s2138_s26 = smov [#allocation2]   ;;  %s2087_s30 = scalar_lea.hbm %s2380_s0, 256 }
  0x13   :  { %s15_s27 = sshll.u32 %s2138_s26, 4  ;;  %p2088_p8 = scmp.ne.s32.totalorder %s2380_s0, %s2087_s30  ;;  %s16_s27 = int_to_ptr.vmem [resolvable:$true] %s15_s27 }
  0x14   :  { %p2091_p9 = scmp.lt.u32.totalorder %s2087_s30, %s2380_s0 }
  0x16   :  { %p2093_p10 = pnand %p2091_p9, %p2088_p8 }
  0x18   :  { %2096 = shalt.err (!%p2093_p10)
}
  0x19   :  { %s2097_s8 = scalar_lea.vmem %s16_s27, 256  ;;  %p2102_p12 = scmp.lt.s32.totalorder %s16_s27, %s16_s27 }
  0x1a   :  { %p2098_p11 = scmp.ne.s32.totalorder %s16_s27, %s2097_s8  ;;  %p2103_p13 = scmp.lt.s32.totalorder %s2097_s8, %s2097_s8 }
  0x1c   :  { %p2104_p0 = por %p2103_p13, %p2102_p12 }
  0x1e   :  { %p2105_p1 = pnand %p2104_p0, %p2098_p11 }
  0x20   :  { %2108 = shalt.err (!%p2105_p1)
}
  0x21   :  { %s2139_s1 = smov 128   ;;  %s2140_s9 = smov 8  }
  0x22   :  { %21 = dma.hbm_to_vmem [thread:$0]  %s2380_s0, 256, %s16_s27, [#allocation3], %s2139_s1, %s2139_s1, %s2140_s9  }
  0x23   :  { %s2141_s12 = smov [#allocation6]   ;;  %s2109_s16 = scalar_lea.hbm %s2382_s2, 512 }
  0x24   :  { %s39_s13 = sshll.u32 %s2141_s12, 4  ;;  %p2110_p2 = scmp.ne.s32.totalorder %s2382_s2, %s2109_s16  ;;  %s40_s13 = int_to_ptr.vmem [resolvable:$true] %s39_s13 }
  0x25   :  { %p2113_p3 = scmp.lt.u32.totalorder %s2109_s16, %s2382_s2 }
  0x27   :  { %p2115_p4 = pnand %p2113_p3, %p2110_p2 }
  0x29   :  { %2118 = shalt.err (!%p2115_p4)
}
  0x2a   :  { %s2119_s21 = scalar_lea.vmem %s40_s13, 512  ;;  %p2124_p6 = scmp.lt.s32.totalorder %s40_s13, %s40_s13 }
  0x2b   :  { %p2120_p5 = scmp.ne.s32.totalorder %s40_s13, %s2119_s21  ;;  %p2125_p7 = scmp.lt.s32.totalorder %s2119_s21, %s2119_s21 }
  0x2d   :  { %p2126_p8 = por %p2125_p7, %p2124_p6 }
  0x2f   :  { %p2127_p9 = pnand %p2126_p8, %p2120_p5 }
  0x31   :  { %2130 = shalt.err (!%p2127_p9)
}
  0x32   :  { %45 = dma.hbm_to_vmem [thread:$0]  %s2382_s2, 512, %s40_s13, [#allocation5], %s2139_s1, %s2139_s1, %s2140_s9  }
  0x33   :  { %2131 = dma.done.wait [#allocation3], 256  }
  0x34   :  { %2132 = vsyncadd [#allocation3], 4294967040 }
  0x35   :  { %2133 = dma.done.wait [#allocation5], 11776  }
  0x36   :  { %2134 = vsyncadd [#allocation5], 4294955520  ;;  %v2142_v0 = vmov 0.0   ;;  %vm2143_vm0 = vmmov 0   ;;  %v1956_v1 = vld [vmem:[#allocation4] sm:$0xff]   ;;  %v1957_v2 = vld [vmem:[#allocation4 + $0x8] sm:$0xff]   ;;  %v189_v41 = vlaneseq }
  0x37   :  { %1727 = vmatprep.subr.bf16.mxu0 %v2142_v0  ;;  %1743 = vmatprep.mubr.msk.bf16.mxu0 %vm2143_vm0, %v2142_v0  ;;  %v1958_v3 = vld [vmem:[#allocation4 + $0x10] sm:$0xff]   ;;  %v1959_v4 = vld [vmem:[#allocation4 + $0x18] sm:$0xff]   ;;  %v1960_v5 = vld [vmem:[#allocation4 + $0x20] sm:$0xff]  }
  0x38   :  { %1747 = vmatprep.subr.bf16.mxu1 %v2142_v0  ;;  %1763 = vmatprep.mubr.msk.bf16.mxu1 %vm2143_vm0, %v2142_v0  ;;  %v1961_v6 = vld [vmem:[#allocation4 + $0x28] sm:$0xff]   ;;  %v1962_v7 = vld [vmem:[#allocation4 + $0x30] sm:$0xff]   ;;  %v1963_v8 = vld [vmem:[#allocation4 + $0x38] sm:$0xff]   ;;  %v2224_v42 = vshrl.u32 %v189_v41, 7 }
  0x39   :  { %1728 = vmatpush3.bf16.msra.mxu0 %v1956_v1  ;;  %v60_v9 = vld [vmem:[#allocation2] sm:$0xff]  ;;  %v1964_v11 = vld [vmem:[#allocation4 + $0x40] sm:$0xff]   ;;  %v1965_v12 = vld [vmem:[#allocation4 + $0x48] sm:$0xff]  }
  0x3a   :  { %1729 = vmatprep.subr.bf16.mxu0 %v2142_v0  ;;  %v63_v10 = vpack.c.bf16 %v60_v9, %v60_v9  ;;  %1748 = vmatpush3.bf16.msra.mxu1 %v1964_v11  ;;  %v1966_v13 = vld [vmem:[#allocation4 + $0x50] sm:$0xff]   ;;  %v1967_v14 = vld [vmem:[#allocation4 + $0x58] sm:$0xff]   ;;  %v1968_v15 = vld [vmem:[#allocation4 + $0x60] sm:$0xff]   ;;  %v2229_v44 = vsub.s32 3, %v2224_v42  ;;  %v2232_v45 = vsub.s32 4, %v2224_v42 }
  0x3b   :  { %1749 = vmatprep.subr.bf16.mxu1 %v2142_v0  ;;  %v1969_v16 = vld [vmem:[#allocation4 + $0x68] sm:$0xff]   ;;  %v1970_v17 = vld [vmem:[#allocation4 + $0x70] sm:$0xff]   ;;  %v1971_v18 = vld [vmem:[#allocation4 + $0x78] sm:$0xff]  }
  0x3c   :  { %v2226_v43 = vld [vmem:[#allocation6 + $0x8] sm:$0xff]  ;;  %v2234_v47 = vld [vmem:[#allocation6 + $0x10] sm:$0xff]  ;;  %v1972_v56 = vld [vmem:[#allocation4 + $0x80] sm:$0xff]  }
  0x3d   :  { %1730 = vmatpush3.bf16.msra.mxu0 %v1957_v2  ;;  %v197_v51 = vrot.slane %v2234_v47, %v2232_v45  ;;  %v1973_v57 = vld [vmem:[#allocation4 + $0x88] sm:$0xff]   ;;  %v1974_v58 = vld [vmem:[#allocation4 + $0x90] sm:$0xff]   ;;  %v1975_v59 = vld [vmem:[#allocation4 + $0x98] sm:$0xff]  }
  0x3e   :  { %1731 = vmatprep.subr.bf16.mxu0 %v2142_v0  ;;  %1750 = vmatpush3.bf16.msra.mxu1 %v1965_v12  ;;  %v1976_v60 = vld [vmem:[#allocation4 + $0xa0] sm:$0xff]   ;;  %v1977_v61 = vld [vmem:[#allocation4 + $0xa8] sm:$0xff]   ;;  %v1978_v62 = vld [vmem:[#allocation4 + $0xb0] sm:$0xff]  }
  0x3f   :  { %1751 = vmatprep.subr.bf16.mxu1 %v2142_v0  ;;  %v1979_v63 = vld [vmem:[#allocation4 + $0xb8] sm:$0xff]  }
  0x41   :  { %1732 = vmatpush3.bf16.msra.mxu0 %v1958_v3 }
  0x42   :  { %1733 = vmatprep.subr.bf16.mxu0 %v2142_v0  ;;  %1752 = vmatpush3.bf16.msra.mxu1 %v1966_v13 }
  0x43   :  { %1753 = vmatprep.subr.bf16.mxu1 %v2142_v0 }
  0x45   :  { %1734 = vmatpush3.bf16.msra.mxu0 %v1959_v4 }
  0x46   :  { %1735 = vmatprep.subr.bf16.mxu0 %v2142_v0  ;;  %1754 = vmatpush3.bf16.msra.mxu1 %v1967_v14 }
  0x47   :  { %1755 = vmatprep.subr.bf16.mxu1 %v2142_v0 }
  0x49   :  { %1736 = vmatpush3.bf16.msra.mxu0 %v1960_v5 }
  0x4a   :  { %1737 = vmatprep.subr.bf16.mxu0 %v2142_v0  ;;  %1756 = vmatpush3.bf16.msra.mxu1 %v1968_v15 }
  0x4b   :  { %1757 = vmatprep.subr.bf16.mxu1 %v2142_v0 }
  0x4d   :  { %1738 = vmatpush3.bf16.msra.mxu0 %v1961_v6 }
  0x4e   :  { %1739 = vmatprep.subr.bf16.mxu0 %v2142_v0  ;;  %1758 = vmatpush3.bf16.msra.mxu1 %v1969_v16 }
  0x4f   :  { %1759 = vmatprep.subr.bf16.mxu1 %v2142_v0 }
  0x51   :  { %1740 = vmatpush3.bf16.msra.mxu0 %v1962_v7 }
  0x52   :  { %1741 = vmatprep.subr.bf16.mxu0 %v2142_v0  ;;  %1760 = vmatpush3.bf16.msra.mxu1 %v1970_v17 }
  0x53   :  { %1761 = vmatprep.subr.bf16.mxu1 %v2142_v0 }
  0x55   :  { %1742 = vmatpush3.bf16.msra.mxu0 %v1963_v8 }
  0x56   :  { %1767 = vmatprep.subr.bf16.mxu0 %v2142_v0  ;;  %1762 = vmatpush3.bf16.msra.mxu1 %v1971_v18 }
  0x57   :  { %1787 = vmatprep.subr.bf16.mxu1 %v2142_v0 }
  0x58   :  { %1744 = vmatmul.mubr.bf16.vlgmr.msra.gmra.mrb[0].mxu0 %v63_v10 }
  0x59   :  { %1783 = vmatprep.mubr.msk.bf16.mxu0 %vm2143_vm0, %v2142_v0  ;;  %1768 = vmatpush3.bf16.msra.mxu0 %v1972_v56 }
  0x5a   :  { %1769 = vmatprep.subr.bf16.mxu0 %v2142_v0 }
  0x5d   :  { %1770 = vmatpush3.bf16.msra.mxu0 %v1973_v57 }
  0x5e   :  { %1771 = vmatprep.subr.bf16.mxu0 %v2142_v0 }
  0x61   :  { %1772 = vmatpush3.bf16.msra.mxu0 %v1974_v58 }
  0x62   :  { %1773 = vmatprep.subr.bf16.mxu0 %v2142_v0 }
  0x65   :  { %1774 = vmatpush3.bf16.msra.mxu0 %v1975_v59 }
  0x66   :  { %1775 = vmatprep.subr.bf16.mxu0 %v2142_v0 }
  0x69   :  { %1776 = vmatpush3.bf16.msra.mxu0 %v1976_v60 }
  0x6a   :  { %1777 = vmatprep.subr.bf16.mxu0 %v2142_v0 }
  0x6d   :  { %1778 = vmatpush3.bf16.msra.mxu0 %v1977_v61 }
  0x6e   :  { %1779 = vmatprep.subr.bf16.mxu0 %v2142_v0 }
  0x71   :  { %1780 = vmatpush3.bf16.msra.mxu0 %v1978_v62 }
  0x72   :  { %1781 = vmatprep.subr.bf16.mxu0 %v2142_v0 }
  0x75   :  { %1782 = vmatpush3.bf16.msra.mxu0 %v1979_v63 }
  0x76   :  { %1807 = vmatprep.subr.bf16.mxu0 %v2142_v0 }
 0x12b   :  { %v162_v19 = vpop.f32.mrb[0].mxu0 }
 0x12c   :  { %v168_v20 = vrot.slane %v162_v19, 4  ;;  %v174_v21 = vmul.f32 %v162_v19, %v162_v19  ;;  %v1745_v22 = vpop.f32.mrb[1].mxu0 }
 0x12d   :  { %v165_v23 = vpop.f32.mrb[2].mxu0 }
 0x12e   :  { %v169_v24 = vadd.f32 %v168_v20, %v162_v19  ;;  %v175_v25 = vrot.slane %v174_v21, 4  ;;  %v1746_v26 = vpop.f32.mrb[3].mxu0  ;;  %v2251_v23 = vsub.s32 5, %v2224_v42 }
 0x130   :  { %v170_v27 = vrot.slane %v169_v24, 2  ;;  %v176_v28 = vadd.f32 %v175_v25, %v174_v21 }
 0x132   :  { %v171_v29 = vadd.f32 %v170_v27, %v169_v24  ;;  %v177_v30 = vrot.slane %v176_v28, 2 }
 0x134   :  { %v172_v31 = vrot.slane %v171_v29, 1  ;;  %v178_v32 = vadd.f32 %v177_v30, %v176_v28  ;;  %v335_v28 = vrot.slane %v2234_v47, %v2251_v23 }
 0x136   :  { %v173_v33 = vadd.f32 %v172_v31, %v171_v29  ;;  %v179_v34 = vrot.slane %v178_v32, 1 }
 0x138   :  { %v180_v35 = vadd.f32 %v179_v34, %v178_v32  ;;  %v181_v36 = vmul.f32 0.125, %v173_v33  ;;  %v1980_v33 = vld [vmem:[#allocation4 + $0xc0] sm:$0xff]   ;;  %v1981_v34 = vld [vmem:[#allocation4 + $0xc8] sm:$0xff]  }
 0x13a   :  { %v182_v37 = vmul.f32 0.125, %v180_v35  ;;  %v183_v38 = vmul.f32 %v181_v36, %v181_v36  ;;  %v188_v49 = vsub.f32 %v162_v19, %v181_v36  ;;  %v1982_v35 = vld [vmem:[#allocation4 + $0xd0] sm:$0xff]   ;;  %v1983_v36 = vld [vmem:[#allocation4 + $0xd8] sm:$0xff]  }
 0x13c   :  { %v184_v39 = vsub.f32 %v182_v37, %v183_v38  ;;  %v1984_v37 = vld [vmem:[#allocation4 + $0xe0] sm:$0xff]   ;;  %v1985_v38 = vld [vmem:[#allocation4 + $0xe8] sm:$0xff]  }
 0x13e   :  { %v185_v40 = vadd.f32 1e-05, %v184_v39  ;;  %v1986_v39 = vld [vmem:[#allocation4 + $0xf0] sm:$0xff]  }
 0x140   :  { %2044 = vrsqrt.f32 %v185_v40  ;;  %v1987_v40 = vld [vmem:[#allocation4 + $0xf8] sm:$0xff]  }
 0x14a   :  { %v2045_v46 = vpop.eup %2044 }
 0x14b   :  { %v187_v48 = vmul.f32 %v2045_v46, %v2226_v43 }
 0x14d   :  { %v192_v50 = vrot.slane %v187_v48, %v2229_v44 }
 0x14f   :  { %v193_v52 = vmul.f32 %v192_v50, %v188_v49 }
 0x151   :  { %v198_v53 = vadd.f32 %v197_v51, %v193_v52 }
 0x153   :  { %v199_v54 = vmax.f32 %v198_v53, 0.0 }
 0x155   :  { %v200_v55 = vpack.c.bf16 %v199_v54, %v199_v54 }
 0x157   :  { %1764 = vmatmul.mubr.bf16.vlgmr.msra.gmra.mrb[0].mxu1 %v200_v55 }
 0x158   :  { %1803 = vmatprep.mubr.msk.bf16.mxu1 %vm2143_vm0, %v2142_v0  ;;  %1788 = vmatpush3.bf16.msra.mxu1 %v1980_v33 }
 0x159   :  { %1789 = vmatprep.subr.bf16.mxu1 %v2142_v0 }
 0x15c   :  { %1790 = vmatpush3.bf16.msra.mxu1 %v1981_v34 }
 0x15d   :  { %1791 = vmatprep.subr.bf16.mxu1 %v2142_v0 }
 0x160   :  { %1792 = vmatpush3.bf16.msra.mxu1 %v1982_v35 }
 0x161   :  { %1793 = vmatprep.subr.bf16.mxu1 %v2142_v0 }
 0x164   :  { %1794 = vmatpush3.bf16.msra.mxu1 %v1983_v36 }
 0x165   :  { %1795 = vmatprep.subr.bf16.mxu1 %v2142_v0 }
 0x168   :  { %1796 = vmatpush3.bf16.msra.mxu1 %v1984_v37 }
 0x169   :  { %1797 = vmatprep.subr.bf16.mxu1 %v2142_v0 }
 0x16c   :  { %1798 = vmatpush3.bf16.msra.mxu1 %v1985_v38 }
 0x16d   :  { %1799 = vmatprep.subr.bf16.mxu1 %v2142_v0 }
 0x170   :  { %1800 = vmatpush3.bf16.msra.mxu1 %v1986_v39 }
 0x171   :  { %1801 = vmatprep.subr.bf16.mxu1 %v2142_v0 }
 0x174   :  { %1802 = vmatpush3.bf16.msra.mxu1 %v1987_v40 }
 0x175   :  { %1827 = vmatprep.subr.bf16.mxu1 %v2142_v0 }
 0x22a   :  { %v300_v1 = vpop.f32.mrb[0].mxu1 }
 0x22b   :  { %v306_v2 = vrot.slane %v300_v1, 4  ;;  %v312_v3 = vmul.f32 %v300_v1, %v300_v1  ;;  %v1765_v4 = vpop.f32.mrb[1].mxu1 }
 0x22c   :  { %v303_v5 = vpop.f32.mrb[2].mxu1 }
 0x22d   :  { %v307_v6 = vadd.f32 %v306_v2, %v300_v1  ;;  %v313_v7 = vrot.slane %v312_v3, 4  ;;  %v1766_v8 = vpop.f32.mrb[3].mxu1  ;;  %v472_v5 = vsub.s32 6, %v2224_v42 }
 0x22f   :  { %v308_v9 = vrot.slane %v307_v6, 2  ;;  %v314_v10 = vadd.f32 %v313_v7, %v312_v3 }
 0x231   :  { %v309_v11 = vadd.f32 %v308_v9, %v307_v6  ;;  %v315_v12 = vrot.slane %v314_v10, 2 }
 0x233   :  { %v310_v13 = vrot.slane %v309_v11, 1  ;;  %v316_v14 = vadd.f32 %v315_v12, %v314_v10  ;;  %v473_v10 = vrot.slane %v2234_v47, %v472_v5 }
 0x235   :  { %v311_v15 = vadd.f32 %v310_v13, %v309_v11  ;;  %v317_v16 = vrot.slane %v316_v14, 1 }
 0x237   :  { %v318_v17 = vadd.f32 %v317_v16, %v316_v14  ;;  %v319_v18 = vmul.f32 0.125, %v311_v15  ;;  %v1988_v15 = vld [vmem:[#allocation4 + $0x100] sm:$0xff]  }
 0x238   :  { %v1989_v16 = vld [vmem:[#allocation4 + $0x140] sm:$0xff]  }
 0x239   :  { %v320_v19 = vmul.f32 0.125, %v318_v17  ;;  %v321_v20 = vmul.f32 %v319_v18, %v319_v18  ;;  %v326_v26 = vsub.f32 %v300_v1, %v319_v18  ;;  %v1990_v17 = vld [vmem:[#allocation4 + $0x108] sm:$0xff]  }
 0x23a   :  { %v1991_v18 = vld [vmem:[#allocation4 + $0x148] sm:$0xff]  }
 0x23b   :  { %v322_v21 = vsub.f32 %v320_v19, %v321_v20  ;;  %v1992_v19 = vld [vmem:[#allocation4 + $0x110] sm:$0xff]  }
 0x23c   :  { %v1993_v20 = vld [vmem:[#allocation4 + $0x150] sm:$0xff]  }
 0x23d   :  { %v323_v22 = vadd.f32 1e-05, %v322_v21  ;;  %v1994_v21 = vld [vmem:[#allocation4 + $0x118] sm:$0xff]  }
 0x23f   :  { %2046 = vrsqrt.f32 %v323_v22  ;;  %v1995_v22 = vld [vmem:[#allocation4 + $0x158] sm:$0xff]  }
 0x249   :  { %v2047_v24 = vpop.eup %2046 }
 0x24a   :  { %v325_v25 = vmul.f32 %v2047_v24, %v2226_v43  ;;  %v1996_v24 = vld [vmem:[#allocation4 + $0x120] sm:$0xff]  }
 0x24c   :  { %v330_v27 = vrot.slane %v325_v25, %v2232_v45  ;;  %v1997_v25 = vld [vmem:[#allocation4 + $0x160] sm:$0xff]  }
 0x24e   :  { %v331_v29 = vmul.f32 %v330_v27, %v326_v26  ;;  %v1998_v26 = vld [vmem:[#allocation4 + $0x128] sm:$0xff]  }
 0x24f   :  { %v1999_v27 = vld [vmem:[#allocation4 + $0x168] sm:$0xff]  }
 0x250   :  { %v336_v30 = vadd.f32 %v335_v28, %v331_v29  ;;  %v2000_v28 = vld [vmem:[#allocation4 + $0x130] sm:$0xff]  }
 0x251   :  { %v2001_v29 = vld [vmem:[#allocation4 + $0x170] sm:$0xff]  }
 0x252   :  { %v337_v31 = vmax.f32 %v336_v30, 0.0  ;;  %v2002_v30 = vld [vmem:[#allocation4 + $0x138] sm:$0xff]  }
 0x254   :  { %v338_v32 = vpack.c.bf16 %v337_v31, %v337_v31  ;;  %v2003_v31 = vld [vmem:[#allocation4 + $0x178] sm:$0xff]  }
 0x256   :  { %1784 = vmatmul.mubr.bf16.vlgmr.msra.gmra.mrb[4].mxu0 %v338_v32 }
 0x257   :  { %1823 = vmatprep.mubr.msk.bf16.mxu0 %vm2143_vm0, %v2142_v0  ;;  %1808 = vmatpush3.bf16.msra.mxu0 %v1988_v15 }
 0x258   :  { %1809 = vmatprep.subr.bf16.mxu0 %v2142_v0 }
 0x25b   :  { %1810 = vmatpush3.bf16.msra.mxu0 %v1990_v17 }
 0x25c   :  { %1811 = vmatprep.subr.bf16.mxu0 %v2142_v0 }
 0x25f   :  { %1812 = vmatpush3.bf16.msra.mxu0 %v1992_v19 }
 0x260   :  { %1813 = vmatprep.subr.bf16.mxu0 %v2142_v0 }
 0x263   :  { %1814 = vmatpush3.bf16.msra.mxu0 %v1994_v21 }
 0x264   :  { %1815 = vmatprep.subr.bf16.mxu0 %v2142_v0 }
 0x267   :  { %1816 = vmatpush3.bf16.msra.mxu0 %v1996_v24 }
 0x268   :  { %1817 = vmatprep.subr.bf16.mxu0 %v2142_v0 }
 0x26b   :  { %1818 = vmatpush3.bf16.msra.mxu0 %v1998_v26 }
 0x26c   :  { %1819 = vmatprep.subr.bf16.mxu0 %v2142_v0 }
 0x26f   :  { %1820 = vmatpush3.bf16.msra.mxu0 %v2000_v28 }
 0x270   :  { %1821 = vmatprep.subr.bf16.mxu0 %v2142_v0 }
 0x273   :  { %1822 = vmatpush3.bf16.msra.mxu0 %v2002_v30 }
 0x274   :  { %1847 = vmatprep.subr.bf16.mxu0 %v2142_v0 }
 0x329   :  { %v438_v41 = vpop.f32.mrb[4].mxu0 }
 0x32a   :  { %v444_v46 = vrot.slane %v438_v41, 4  ;;  %v450_v48 = vmul.f32 %v438_v41, %v438_v41  ;;  %v1785_v49 = vpop.f32.mrb[5].mxu0 }
 0x32b   :  { %v441_v50 = vpop.f32.mrb[6].mxu0 }
 0x32c   :  { %v445_v51 = vadd.f32 %v444_v46, %v438_v41  ;;  %v451_v52 = vrot.slane %v450_v48, 4  ;;  %v1786_v53 = vpop.f32.mrb[7].mxu0 }
 0x32e   :  { %v446_v54 = vrot.slane %v445_v51, 2  ;;  %v452_v55 = vadd.f32 %v451_v52, %v450_v48 }
 0x330   :  { %v447_v56 = vadd.f32 %v446_v54, %v445_v51  ;;  %v453_v57 = vrot.slane %v452_v55, 2 }
 0x332   :  { %v448_v58 = vrot.slane %v447_v56, 1  ;;  %v454_v59 = vadd.f32 %v453_v57, %v452_v55 }
 0x334   :  { %v449_v60 = vadd.f32 %v448_v58, %v447_v56  ;;  %v455_v61 = vrot.slane %v454_v59, 1 }
 0x336   :  { %v456_v62 = vadd.f32 %v455_v61, %v454_v59  ;;  %v457_v63 = vmul.f32 0.125, %v449_v60  ;;  %v610_v59 = vsub.s32 7, %v2224_v42 }
 0x338   :  { %v458_v1 = vmul.f32 0.125, %v456_v62  ;;  %v459_v2 = vmul.f32 %v457_v63, %v457_v63  ;;  %v464_v8 = vsub.f32 %v438_v41, %v457_v63 }
 0x33a   :  { %v460_v3 = vsub.f32 %v458_v1, %v459_v2  ;;  %v611_v1 = vrot.slane %v2234_v47, %v610_v59 }
 0x33c   :  { %v461_v4 = vadd.f32 1e-05, %v460_v3 }
 0x33e   :  { %2048 = vrsqrt.f32 %v461_v4 }
 0x348   :  { %v2049_v6 = vpop.eup %2048 }
 0x349   :  { %v463_v7 = vmul.f32 %v2049_v6, %v2226_v43  ;;  %v2004_v6 = vld [vmem:[#allocation4 + $0x180] sm:$0xff]  }
 0x34b   :  { %v468_v9 = vrot.slane %v463_v7, %v2251_v23 }
 0x34d   :  { %v469_v11 = vmul.f32 %v468_v9, %v464_v8  ;;  %v2005_v8 = vld [vmem:[#allocation4 + $0x188] sm:$0xff]   ;;  %v2007_v9 = vld [vmem:[#allocation4 + $0x198] sm:$0xff]  }
 0x34f   :  { %v474_v12 = vadd.f32 %v473_v10, %v469_v11  ;;  %v2008_v10 = vld [vmem:[#allocation4 + $0x1a0] sm:$0xff]   ;;  %v2009_v11 = vld [vmem:[#allocation4 + $0x1a8] sm:$0xff]  }
 0x351   :  { %v475_v13 = vmax.f32 %v474_v12, 0.0  ;;  %v2010_v12 = vld [vmem:[#allocation4 + $0x1b0] sm:$0xff]  }
 0x353   :  { %v476_v14 = vpack.c.bf16 %v475_v13, %v475_v13  ;;  %v2011_v13 = vld [vmem:[#allocation4 + $0x1b8] sm:$0xff]  }
 0x355   :  { %1804 = vmatmul.mubr.bf16.vlgmr.msra.gmra.mrb[4].mxu1 %v476_v14  ;;  %v56_v14 = vld [vmem:[#allocation6] sm:$0xff] }
 0x356   :  { %1843 = vmatprep.mubr.msk.bf16.mxu1 %vm2143_vm0, %v2142_v0  ;;  %1828 = vmatpush3.bf16.msra.mxu1 %v1989_v16  ;;  %v635_v15 = vrot.slane %v56_v14, %v2232_v45  ;;  %v744_v16 = vrot.slane %v56_v14, %v2251_v23 }
 0x357   :  { %1829 = vmatprep.subr.bf16.mxu1 %v2142_v0 }
 0x35a   :  { %1830 = vmatpush3.bf16.msra.mxu1 %v1991_v18 }
 0x35b   :  { %1831 = vmatprep.subr.bf16.mxu1 %v2142_v0 }
 0x35e   :  { %1832 = vmatpush3.bf16.msra.mxu1 %v1993_v20 }
 0x35f   :  { %1833 = vmatprep.subr.bf16.mxu1 %v2142_v0 }
 0x362   :  { %1834 = vmatpush3.bf16.msra.mxu1 %v1995_v22 }
 0x363   :  { %1835 = vmatprep.subr.bf16.mxu1 %v2142_v0 }
 0x366   :  { %1836 = vmatpush3.bf16.msra.mxu1 %v1997_v25 }
 0x367   :  { %1837 = vmatprep.subr.bf16.mxu1 %v2142_v0 }
 0x36a   :  { %1838 = vmatpush3.bf16.msra.mxu1 %v1999_v27 }
 0x36b   :  { %1839 = vmatprep.subr.bf16.mxu1 %v2142_v0 }
 0x36e   :  { %1840 = vmatpush3.bf16.msra.mxu1 %v2001_v29  ;;  %v62_v29 = vld [vmem:[#allocation2 + $0x8] sm:$0xff] }
 0x36f   :  { %1841 = vmatprep.subr.bf16.mxu1 %v2142_v0 }
 0x372   :  { %1842 = vmatpush3.bf16.msra.mxu1 %v2003_v31 }
 0x373   :  { %1867 = vmatprep.subr.bf16.mxu1 %v2142_v0 }
 0x428   :  { %v576_v32 = vpop.f32.mrb[4].mxu1 }
 0x429   :  { %v582_v33 = vrot.slane %v576_v32, 4  ;;  %v588_v34 = vmul.f32 %v576_v32, %v576_v32  ;;  %v1805_v35 = vpop.f32.mrb[5].mxu1 }
 0x42a   :  { %v579_v36 = vpop.f32.mrb[6].mxu1  ;;  %v2013_v35 = vld [vmem:[#allocation4 + $0x1c8] sm:$0xff]  }
 0x42b   :  { %v583_v37 = vadd.f32 %v582_v33, %v576_v32  ;;  %v589_v38 = vrot.slane %v588_v34, 4  ;;  %v1806_v39 = vpop.f32.mrb[7].mxu1  ;;  %v2014_v36 = vld [vmem:[#allocation4 + $0x1d0] sm:$0xff]  }
 0x42c   :  { %v2017_v39 = vld [vmem:[#allocation4 + $0x1e8] sm:$0xff]  }
 0x42d   :  { %v584_v40 = vrot.slane %v583_v37, 2  ;;  %v590_v41 = vadd.f32 %v589_v38, %v588_v34  ;;  %v2012_v34 = vld [vmem:[#allocation4 + $0x1c0] sm:$0xff]  }
 0x42e   :  { %v2016_v38 = vld [vmem:[#allocation4 + $0x1e0] sm:$0xff]  }
 0x42f   :  { %v585_v46 = vadd.f32 %v584_v40, %v583_v37  ;;  %v591_v48 = vrot.slane %v590_v41, 2  ;;  %v2015_v37 = vld [vmem:[#allocation4 + $0x1d8] sm:$0xff]   ;;  %v2018_v40 = vld [vmem:[#allocation4 + $0x1f0] sm:$0xff]  }
 0x431   :  { %v586_v49 = vrot.slane %v585_v46, 1  ;;  %v592_v50 = vadd.f32 %v591_v48, %v590_v41  ;;  %v2019_v41 = vld [vmem:[#allocation4 + $0x1f8] sm:$0xff]  }
 0x433   :  { %v587_v51 = vadd.f32 %v586_v49, %v585_v46  ;;  %v593_v52 = vrot.slane %v592_v50, 1 }
 0x435   :  { %v594_v53 = vadd.f32 %v593_v52, %v592_v50  ;;  %v595_v54 = vmul.f32 0.125, %v587_v51 }
 0x437   :  { %v596_v55 = vmul.f32 0.125, %v594_v53  ;;  %v597_v56 = vmul.f32 %v595_v54, %v595_v54  ;;  %v602_v62 = vsub.f32 %v576_v32, %v595_v54 }
 0x439   :  { %v598_v57 = vsub.f32 %v596_v55, %v597_v56 }
 0x43b   :  { %v599_v58 = vadd.f32 1e-05, %v598_v57 }
 0x43d   :  { %2050 = vrsqrt.f32 %v599_v58 }
 0x447   :  { %v2051_v60 = vpop.eup %2050 }
 0x448   :  { %v601_v61 = vmul.f32 %v2051_v60, %v2226_v43 }
 0x44a   :  { %v606_v63 = vrot.slane %v601_v61, %v472_v5  ;;  %v2006_v5 = vld [vmem:[#allocation4 + $0x190] sm:$0xff]  }
 0x44c   :  { %v607_v2 = vmul.f32 %v606_v63, %v602_v62 }
 0x44e   :  { %v612_v3 = vadd.f32 %v611_v1, %v607_v2 }
 0x450   :  { %v613_v4 = vmax.f32 %v612_v3, 0.0 }
 0x452   :  { %v614_v7 = vpack.c.bf16 %v613_v4, %v613_v4 }
 0x454   :  { %1824 = vmatmul.mubr.bf16.vlgmr.msra.gmra.mrb[8].mxu0 %v614_v7  ;;  %1844 = vmatmul.mubr.bf16.vlgmr.msra.gmra.mrb[8].mxu1 %v614_v7 }
 0x455   :  { %1848 = vmatpush3.bf16.msra.mxu0 %v2004_v6  ;;  %1863 = vmatprep.mubr.msk.bf16.mxu0 %vm2143_vm0, %v2142_v0 }
 0x456   :  { %1849 = vmatprep.subr.bf16.mxu0 %v2142_v0  ;;  %1883 = vmatprep.mubr.msk.bf16.mxu1 %vm2143_vm0, %v2142_v0 }
 0x457   :  { %1868 = vmatpush3.bf16.msra.mxu1 %v2012_v34 }
 0x458   :  { %1869 = vmatprep.subr.bf16.mxu1 %v2142_v0 }
 0x459   :  { %1850 = vmatpush3.bf16.msra.mxu0 %v2005_v8  ;;  %v976_v8 = vsub.s32 0, %v2224_v42 }
 0x45a   :  { %1851 = vmatprep.subr.bf16.mxu0 %v2142_v0 }
 0x45b   :  { %1870 = vmatpush3.bf16.msra.mxu1 %v2013_v35 }
 0x45c   :  { %1871 = vmatprep.subr.bf16.mxu1 %v2142_v0 }
 0x45d   :  { %1852 = vmatpush3.bf16.msra.mxu0 %v2006_v5 }
 0x45e   :  { %1853 = vmatprep.subr.bf16.mxu0 %v2142_v0 }
 0x45f   :  { %1872 = vmatpush3.bf16.msra.mxu1 %v2014_v36 }
 0x460   :  { %1873 = vmatprep.subr.bf16.mxu1 %v2142_v0 }
 0x461   :  { %1854 = vmatpush3.bf16.msra.mxu0 %v2007_v9  ;;  %v2329_v9 = vld [vmem:[#allocation6 + $0x18] sm:$0x1f] }
 0x462   :  { %1855 = vmatprep.subr.bf16.mxu0 %v2142_v0 }
 0x463   :  { %1874 = vmatpush3.bf16.msra.mxu1 %v2015_v37 }
 0x464   :  { %1875 = vmatprep.subr.bf16.mxu1 %v2142_v0 }
 0x465   :  { %1856 = vmatpush3.bf16.msra.mxu0 %v2008_v10 }
 0x466   :  { %1857 = vmatprep.subr.bf16.mxu0 %v2142_v0 }
 0x467   :  { %1876 = vmatpush3.bf16.msra.mxu1 %v2016_v38 }
 0x468   :  { %1877 = vmatprep.subr.bf16.mxu1 %v2142_v0 }
 0x469   :  { %1858 = vmatpush3.bf16.msra.mxu0 %v2009_v11 }
 0x46a   :  { %1859 = vmatprep.subr.bf16.mxu0 %v2142_v0 }
 0x46b   :  { %1878 = vmatpush3.bf16.msra.mxu1 %v2017_v39 }
 0x46c   :  { %1879 = vmatprep.subr.bf16.mxu1 %v2142_v0 }
 0x46d   :  { %1860 = vmatpush3.bf16.msra.mxu0 %v2010_v12 }
 0x46e   :  { %1861 = vmatprep.subr.bf16.mxu0 %v2142_v0 }
 0x46f   :  { %1880 = vmatpush3.bf16.msra.mxu1 %v2018_v40 }
 0x470   :  { %1881 = vmatprep.subr.bf16.mxu1 %v2142_v0 }
 0x471   :  { %1862 = vmatpush3.bf16.msra.mxu0 %v2011_v13  ;;  %v977_v13 = vrot.slane %v2329_v9, %v976_v8 }
 0x472   :  { %1887 = vmatprep.subr.bf16.mxu0 %v2142_v0 }
 0x473   :  { %1882 = vmatpush3.bf16.msra.mxu1 %v2019_v41 }
 0x474   :  { %1907 = vmatprep.subr.bf16.mxu1 %v2142_v0 }
 0x527   :  { %v718_v17 = vpop.f32.mrb[8].mxu0  ;;  %v827_v18 = vpop.f32.mrb[8].mxu1 }
 0x528   :  { %v719_v19 = vadd.f32 %v718_v17, %v635_v15  ;;  %v828_v20 = vadd.f32 %v827_v18, %v744_v16  ;;  %v1825_v21 = vpop.f32.mrb[9].mxu0  ;;  %v1845_v22 = vpop.f32.mrb[9].mxu1  ;;  %v2020_v18 = vld [vmem:[#allocation4 + $0x200] sm:$0xff]  }
 0x529   :  { %v721_v24 = vpop.f32.mrb[10].mxu0  ;;  %v830_v25 = vpop.f32.mrb[10].mxu1  ;;  %v2025_v21 = vld [vmem:[#allocation4 + $0x228] sm:$0xff]   ;;  %v2026_v22 = vld [vmem:[#allocation4 + $0x230] sm:$0xff]  }
 0x52a   :  { %1586 = vst [vmem:[%s2383_s3 + $0x8] sm:$0xff] %v719_v19  ;;  %1587 = vst [vmem:[%s2383_s3 + $0x10] sm:$0xff] %v828_v20  ;;  %v837_v26 = vmul.f32 0.5, %v828_v20  ;;  %v1826_v27 = vpop.f32.mrb[11].mxu0  ;;  %v1846_v28 = vpop.f32.mrb[11].mxu1  ;;  %v2024_v20 = vld [vmem:[#allocation4 + $0x220] sm:$0xff]  }
 0x52b   :  { %v2027_v24 = vld [vmem:[#allocation4 + $0x238] sm:$0xff]  }
 0x52c   :  { %v838_v23 = vmul.f32 1.442695, %v837_v26 }
 0x52e   :  { %2052 = vpow2.f32 %v838_v23 }
 0x538   :  { %v2053_v30 = vpop.eup %2052 }
 0x539   :  { %v840_v31 = vmul.f32 %v2053_v30, %v62_v29 }
 0x53b   :  { %v841_v32 = vadd.f32 %v840_v31, %v719_v19  ;;  %v2023_v19 = vld [vmem:[#allocation4 + $0x218] sm:$0xff]  }
 0x53d   :  { %v842_v33 = vpack.c.bf16 %v841_v32, %v841_v32 }
 0x53f   :  { %1864 = vmatmul.mubr.bf16.vlgmr.msra.gmra.mrb[12].mxu0 %v842_v33 }
 0x540   :  { %1903 = vmatprep.mubr.msk.bf16.mxu0 %vm2143_vm0, %v2142_v0  ;;  %1888 = vmatpush3.bf16.msra.mxu0 %v2020_v18 }
 0x541   :  { %1889 = vmatprep.subr.bf16.mxu0 %v2142_v0 }
 0x612   :  { %v942_v46 = vpop.f32.mrb[12].mxu0 }
 0x613   :  { %v948_v48 = vrot.slane %v942_v46, 4  ;;  %v954_v49 = vmul.f32 %v942_v46, %v942_v46  ;;  %v1865_v50 = vpop.f32.mrb[13].mxu0 }
 0x614   :  { %v945_v51 = vpop.f32.mrb[14].mxu0 }
 0x615   :  { %v949_v52 = vadd.f32 %v948_v48, %v942_v46  ;;  %v955_v53 = vrot.slane %v954_v49, 4  ;;  %v1866_v54 = vpop.f32.mrb[15].mxu0  ;;  %v1114_v51 = vsub.s32 1, %v2224_v42 }
 0x617   :  { %v950_v55 = vrot.slane %v949_v52, 2  ;;  %v956_v56 = vadd.f32 %v955_v53, %v954_v49 }
 0x619   :  { %v951_v57 = vadd.f32 %v950_v55, %v949_v52  ;;  %v957_v58 = vrot.slane %v956_v56, 2 }
 0x61b   :  { %v952_v60 = vrot.slane %v951_v57, 1  ;;  %v958_v61 = vadd.f32 %v957_v58, %v956_v56  ;;  %v1115_v56 = vrot.slane %v2329_v9, %v1114_v51 }
 0x61d   :  { %v953_v62 = vadd.f32 %v952_v60, %v951_v57  ;;  %v959_v63 = vrot.slane %v958_v61, 1 }
 0x61f   :  { %v960_v1 = vadd.f32 %v959_v63, %v958_v61  ;;  %v961_v2 = vmul.f32 0.125, %v953_v62  ;;  %v2028_v62 = vld [vmem:[#allocation4 + $0x240] sm:$0xff]   ;;  %v2029_v63 = vld [vmem:[#allocation4 + $0x248] sm:$0xff]  }
 0x621   :  { %v962_v3 = vmul.f32 0.125, %v960_v1  ;;  %v963_v4 = vmul.f32 %v961_v2, %v961_v2  ;;  %v968_v11 = vsub.f32 %v942_v46, %v961_v2  ;;  %v2030_v1 = vld [vmem:[#allocation4 + $0x250] sm:$0xff]   ;;  %v2031_v2 = vld [vmem:[#allocation4 + $0x258] sm:$0xff]  }
 0x623   :  { %v964_v6 = vsub.f32 %v962_v3, %v963_v4  ;;  %v2032_v3 = vld [vmem:[#allocation4 + $0x260] sm:$0xff]   ;;  %v2033_v4 = vld [vmem:[#allocation4 + $0x268] sm:$0xff]  }
 0x625   :  { %v965_v7 = vadd.f32 1e-05, %v964_v6  ;;  %v2034_v6 = vld [vmem:[#allocation4 + $0x270] sm:$0xff]  }
 0x627   :  { %2054 = vrsqrt.f32 %v965_v7  ;;  %v2035_v7 = vld [vmem:[#allocation4 + $0x278] sm:$0xff]  }
 0x631   :  { %v2055_v5 = vpop.eup %2054 }
 0x632   :  { %v967_v10 = vmul.f32 %v2055_v5, %v2226_v43  ;;  %v2021_v43 = vld [vmem:[#allocation4 + $0x208] sm:$0xff]  }
 0x633   :  { %1890 = vmatpush3.bf16.msra.mxu0 %v2021_v43 }
 0x634   :  { %v972_v12 = vrot.slane %v967_v10, %v610_v59  ;;  %1891 = vmatprep.subr.bf16.mxu0 %v2142_v0  ;;  %v2022_v59 = vld [vmem:[#allocation4 + $0x210] sm:$0xff]  }
 0x636   :  { %v973_v14 = vmul.f32 %v972_v12, %v968_v11 }
 0x637   :  { %1892 = vmatpush3.bf16.msra.mxu0 %v2022_v59 }
 0x638   :  { %v978_v15 = vadd.f32 %v977_v13, %v973_v14  ;;  %1893 = vmatprep.subr.bf16.mxu0 %v2142_v0 }
 0x63a   :  { %v979_v16 = vmax.f32 %v978_v15, 0.0 }
 0x63b   :  { %1894 = vmatpush3.bf16.msra.mxu0 %v2023_v19 }
 0x63c   :  { %v980_v17 = vpack.c.bf16 %v979_v16, %v979_v16  ;;  %1895 = vmatprep.subr.bf16.mxu0 %v2142_v0 }
 0x63e   :  { %1884 = vmatmul.mubr.bf16.vlgmr.msra.gmra.mrb[12].mxu1 %v980_v17 }
 0x63f   :  { %1923 = vmatprep.mubr.msk.bf16.mxu1 %vm2143_vm0, %v2142_v0  ;;  %1896 = vmatpush3.bf16.msra.mxu0 %v2024_v20 }
 0x640   :  { %1897 = vmatprep.subr.bf16.mxu0 %v2142_v0  ;;  %1908 = vmatpush3.bf16.msra.mxu1 %v2028_v62 }
 0x641   :  { %1909 = vmatprep.subr.bf16.mxu1 %v2142_v0 }
 0x643   :  { %1898 = vmatpush3.bf16.msra.mxu0 %v2025_v21 }
 0x644   :  { %1899 = vmatprep.subr.bf16.mxu0 %v2142_v0  ;;  %1910 = vmatpush3.bf16.msra.mxu1 %v2029_v63 }
 0x645   :  { %1911 = vmatprep.subr.bf16.mxu1 %v2142_v0 }
 0x647   :  { %1900 = vmatpush3.bf16.msra.mxu0 %v2026_v22 }
 0x648   :  { %1901 = vmatprep.subr.bf16.mxu0 %v2142_v0  ;;  %1912 = vmatpush3.bf16.msra.mxu1 %v2030_v1 }
 0x649   :  { %1913 = vmatprep.subr.bf16.mxu1 %v2142_v0 }
 0x64b   :  { %1902 = vmatpush3.bf16.msra.mxu0 %v2027_v24 }
 0x64c   :  { %1927 = vmatprep.subr.bf16.mxu0 %v2142_v0  ;;  %1914 = vmatpush3.bf16.msra.mxu1 %v2031_v2 }
 0x64d   :  { %1915 = vmatprep.subr.bf16.mxu1 %v2142_v0 }
 0x650   :  { %1916 = vmatpush3.bf16.msra.mxu1 %v2032_v3 }
 0x651   :  { %1917 = vmatprep.subr.bf16.mxu1 %v2142_v0 }
 0x654   :  { %1918 = vmatpush3.bf16.msra.mxu1 %v2033_v4 }
 0x655   :  { %1919 = vmatprep.subr.bf16.mxu1 %v2142_v0 }
 0x658   :  { %1920 = vmatpush3.bf16.msra.mxu1 %v2034_v6 }
 0x659   :  { %1921 = vmatprep.subr.bf16.mxu1 %v2142_v0 }
 0x65c   :  { %1922 = vmatpush3.bf16.msra.mxu1 %v2035_v7 }
 0x711   :  { %v1080_v25 = vpop.f32.mrb[12].mxu1 }
 0x712   :  { %v1086_v26 = vrot.slane %v1080_v25, 4  ;;  %v1092_v27 = vmul.f32 %v1080_v25, %v1080_v25  ;;  %v1885_v28 = vpop.f32.mrb[13].mxu1 }
 0x713   :  { %v1083_v23 = vpop.f32.mrb[14].mxu1 }
 0x714   :  { %v1087_v29 = vadd.f32 %v1086_v26, %v1080_v25  ;;  %v1093_v30 = vrot.slane %v1092_v27, 4  ;;  %v1886_v31 = vpop.f32.mrb[15].mxu1  ;;  %v1252_v23 = vsub.s32 2, %v2224_v42  ;;  %v2038_v42 = vld [vmem:[#allocation4 + $0x290] sm:$0xff]  }
 0x716   :  { %v1088_v32 = vrot.slane %v1087_v29, 2  ;;  %v1094_v33 = vadd.f32 %v1093_v30, %v1092_v27 }
 0x718   :  { %v1089_v34 = vadd.f32 %v1088_v32, %v1087_v29  ;;  %v1095_v35 = vrot.slane %v1094_v33, 2 }
 0x71a   :  { %v1090_v36 = vrot.slane %v1089_v34, 1  ;;  %v1096_v37 = vadd.f32 %v1095_v35, %v1094_v33  ;;  %v1253_v33 = vrot.slane %v2329_v9, %v1252_v23 }
 0x71c   :  { %v1091_v38 = vadd.f32 %v1090_v36, %v1089_v34  ;;  %v1097_v39 = vrot.slane %v1096_v37, 1 }
 0x71e   :  { %v1098_v40 = vadd.f32 %v1097_v39, %v1096_v37  ;;  %v1099_v41 = vmul.f32 0.125, %v1091_v38  ;;  %v2036_v38 = vld [vmem:[#allocation4 + $0x280] sm:$0xff]   ;;  %v2037_v39 = vld [vmem:[#allocation4 + $0x288] sm:$0xff]  }
 0x720   :  { %v1100_v46 = vmul.f32 0.125, %v1098_v40  ;;  %v1101_v48 = vmul.f32 %v1099_v41, %v1099_v41  ;;  %v1106_v54 = vsub.f32 %v1080_v25, %v1099_v41  ;;  %v2039_v40 = vld [vmem:[#allocation4 + $0x298] sm:$0xff]   ;;  %v2040_v41 = vld [vmem:[#allocation4 + $0x2a0] sm:$0xff]  }
 0x722   :  { %v1102_v49 = vsub.f32 %v1100_v46, %v1101_v48  ;;  %v2041_v46 = vld [vmem:[#allocation4 + $0x2a8] sm:$0xff]   ;;  %v2042_v48 = vld [vmem:[#allocation4 + $0x2b0] sm:$0xff]  }
 0x724   :  { %v1103_v50 = vadd.f32 1e-05, %v1102_v49  ;;  %v2043_v49 = vld [vmem:[#allocation4 + $0x2b8] sm:$0xff]  }
 0x726   :  { %2056 = vrsqrt.f32 %v1103_v50 }
 0x730   :  { %v2057_v52 = vpop.eup %2056 }
 0x731   :  { %v1105_v53 = vmul.f32 %v2057_v52, %v2234_v47 }
 0x733   :  { %v1110_v55 = vrot.slane %v1105_v53, %v976_v8 }
 0x735   :  { %v1111_v57 = vmul.f32 %v1110_v55, %v1106_v54 }
 0x737   :  { %v1116_v58 = vadd.f32 %v1115_v56, %v1111_v57 }
 0x739   :  { %v1117_v60 = vmax.f32 %v1116_v58, 0.0 }
 0x73b   :  { %v1118_v61 = vpack.c.bf16 %v1117_v60, %v1117_v60 }
 0x73d   :  { %1904 = vmatmul.mubr.bf16.vlgmr.msra.gmra.mrb[16].mxu0 %v1118_v61 }
 0x73e   :  { %1943 = vmatprep.mubr.msk.bf16.mxu0 %vm2143_vm0, %v2142_v0  ;;  %1928 = vmatpush3.bf16.msra.mxu0 %v2036_v38 }
 0x73f   :  { %1929 = vmatprep.subr.bf16.mxu0 %v2142_v0 }
 0x742   :  { %1930 = vmatpush3.bf16.msra.mxu0 %v2037_v39  ;;  %v2064_v39 = vld [vmem:[#allocation6 + $0x10] sm:$0xff] }
 0x743   :  { %1931 = vmatprep.subr.bf16.mxu0 %v2142_v0 }
 0x746   :  { %1932 = vmatpush3.bf16.msra.mxu0 %v2038_v42 }
 0x747   :  { %1933 = vmatprep.subr.bf16.mxu0 %v2142_v0 }
 0x74a   :  { %1934 = vmatpush3.bf16.msra.mxu0 %v2039_v40 }
 0x74b   :  { %1935 = vmatprep.subr.bf16.mxu0 %v2142_v0 }
 0x74e   :  { %1936 = vmatpush3.bf16.msra.mxu0 %v2040_v41 }
 0x74f   :  { %1937 = vmatprep.subr.bf16.mxu0 %v2142_v0 }
 0x752   :  { %1938 = vmatpush3.bf16.msra.mxu0 %v2041_v46  ;;  %v1529_v46 = vrot.slane %v2329_v9, %v2232_v45 }
 0x753   :  { %1939 = vmatprep.subr.bf16.mxu0 %v2142_v0 }
 0x756   :  { %1940 = vmatpush3.bf16.msra.mxu0 %v2042_v48 }
 0x757   :  { %1941 = vmatprep.subr.bf16.mxu0 %v2142_v0 }
 0x75a   :  { %1942 = vmatpush3.bf16.msra.mxu0 %v2043_v49 }
 0x810   :  { %v1218_v8 = vpop.f32.mrb[16].mxu0 }
 0x811   :  { %v1224_v5 = vrot.slane %v1218_v8, 4  ;;  %v1230_v10 = vmul.f32 %v1218_v8, %v1218_v8  ;;  %v1905_v11 = vpop.f32.mrb[17].mxu0 }
 0x812   :  { %v1221_v12 = vpop.f32.mrb[18].mxu0 }
 0x813   :  { %v1225_v13 = vadd.f32 %v1224_v5, %v1218_v8  ;;  %v1231_v14 = vrot.slane %v1230_v10, 4  ;;  %v1906_v15 = vpop.f32.mrb[19].mxu0 }
 0x815   :  { %v1226_v16 = vrot.slane %v1225_v13, 2  ;;  %v1232_v17 = vadd.f32 %v1231_v14, %v1230_v10  ;;  %v1391_v14 = vrot.slane %v2329_v9, %v2229_v44 }
 0x817   :  { %v1227_v18 = vadd.f32 %v1226_v16, %v1225_v13  ;;  %v1233_v43 = vrot.slane %v1232_v17, 2 }
 0x819   :  { %v1228_v59 = vrot.slane %v1227_v18, 1  ;;  %v1234_v19 = vadd.f32 %v1233_v43, %v1232_v17 }
 0x81b   :  { %v1229_v20 = vadd.f32 %v1228_v59, %v1227_v18  ;;  %v1235_v21 = vrot.slane %v1234_v19, 1 }
 0x81d   :  { %v1236_v22 = vadd.f32 %v1235_v21, %v1234_v19  ;;  %v1237_v24 = vmul.f32 0.125, %v1229_v20 }
 0x81f   :  { %v1238_v25 = vmul.f32 0.125, %v1236_v22  ;;  %v1239_v26 = vmul.f32 %v1237_v24, %v1237_v24  ;;  %v1244_v31 = vsub.f32 %v1218_v8, %v1237_v24 }
 0x821   :  { %v1240_v27 = vsub.f32 %v1238_v25, %v1239_v26 }
 0x823   :  { %v1241_v28 = vadd.f32 1e-05, %v1240_v27 }
 0x825   :  { %2058 = vrsqrt.f32 %v1241_v28 }
 0x82f   :  { %v2059_v29 = vpop.eup %2058 }
 0x830   :  { %v1243_v30 = vmul.f32 %v2059_v29, %v2234_v47 }
 0x832   :  { %v1248_v32 = vrot.slane %v1243_v30, %v1114_v51 }
 0x834   :  { %v1249_v34 = vmul.f32 %v1248_v32, %v1244_v31 }
 0x836   :  { %v1254_v35 = vadd.f32 %v1253_v33, %v1249_v34 }
 0x838   :  { %v1255_v36 = vmax.f32 %v1254_v35, 0.0 }
 0x83a   :  { %v1256_v37 = vpack.c.bf16 %v1255_v36, %v1255_v36 }
 0x83c   :  { %1924 = vmatmul.mubr.bf16.vlgmr.msra.gmra.mrb[16].mxu1 %v1256_v37 }
 0x90f   :  { %v1356_v50 = vpop.f32.mrb[16].mxu1 }
 0x910   :  { %v1362_v51 = vrot.slane %v1356_v50, 4  ;;  %v1368_v52 = vmul.f32 %v1356_v50, %v1356_v50  ;;  %v1925_v53 = vpop.f32.mrb[17].mxu1 }
 0x911   :  { %v1359_v54 = vpop.f32.mrb[18].mxu1 }
 0x912   :  { %v1363_v55 = vadd.f32 %v1362_v51, %v1356_v50  ;;  %v1369_v56 = vrot.slane %v1368_v52, 4  ;;  %v1926_v57 = vpop.f32.mrb[19].mxu1 }
 0x914   :  { %v1364_v58 = vrot.slane %v1363_v55, 2  ;;  %v1370_v60 = vadd.f32 %v1369_v56, %v1368_v52 }
 0x916   :  { %v1365_v61 = vadd.f32 %v1364_v58, %v1363_v55  ;;  %v1371_v62 = vrot.slane %v1370_v60, 2 }
 0x918   :  { %v1366_v63 = vrot.slane %v1365_v61, 1  ;;  %v1372_v1 = vadd.f32 %v1371_v62, %v1370_v60 }
 0x91a   :  { %v1367_v2 = vadd.f32 %v1366_v63, %v1365_v61  ;;  %v1373_v3 = vrot.slane %v1372_v1, 1 }
 0x91c   :  { %v1374_v4 = vadd.f32 %v1373_v3, %v1372_v1  ;;  %v1375_v6 = vmul.f32 0.125, %v1367_v2 }
 0x91e   :  { %v1376_v0 = vmul.f32 0.125, %v1374_v4  ;;  %v1377_v7 = vmul.f32 %v1375_v6, %v1375_v6  ;;  %v1382_v12 = vsub.f32 %v1356_v50, %v1375_v6 }
 0x920   :  { %v1378_v8 = vsub.f32 %v1376_v0, %v1377_v7 }
 0x922   :  { %v1379_v5 = vadd.f32 1e-05, %v1378_v8 }
 0x924   :  { %2060 = vrsqrt.f32 %v1379_v5 }
 0x92e   :  { %v2061_v10 = vpop.eup %2060 }
 0x92f   :  { %v1381_v11 = vmul.f32 %v2061_v10, %v2234_v47 }
 0x931   :  { %v1386_v13 = vrot.slane %v1381_v11, %v1252_v23 }
 0x933   :  { %v1387_v15 = vmul.f32 %v1386_v13, %v1382_v12 }
 0x935   :  { %v1392_v16 = vadd.f32 %v1391_v14, %v1387_v15 }
 0x937   :  { %v1393_v17 = vmax.f32 %v1392_v16, 0.0 }
 0x939   :  { %v1394_v18 = vpack.c.bf16 %v1393_v17, %v1393_v17 }
 0x93b   :  { %1944 = vmatmul.mubr.bf16.vlgmr.msra.gmra.mrb[20].mxu0 %v1394_v18 }
 0xa0e   :  { %v1494_v43 = vpop.f32.mrb[20].mxu0 }
 0xa0f   :  { %v1500_v59 = vrot.slane %v1494_v43, 4  ;;  %v1506_v19 = vmul.f32 %v1494_v43, %v1494_v43  ;;  %v1945_v20 = vpop.f32.mrb[21].mxu0 }
 0xa10   :  { %v1497_v21 = vpop.f32.mrb[22].mxu0 }
 0xa11   :  { %v1501_v22 = vadd.f32 %v1500_v59, %v1494_v43  ;;  %v1507_v24 = vrot.slane %v1506_v19, 4  ;;  %v1946_v25 = vpop.f32.mrb[23].mxu0 }
 0xa13   :  { %v1502_v26 = vrot.slane %v1501_v22, 2  ;;  %v1508_v47 = vadd.f32 %v1507_v24, %v1506_v19 }
 0xa15   :  { %v1503_v27 = vadd.f32 %v1502_v26, %v1501_v22  ;;  %v1509_v28 = vrot.slane %v1508_v47, 2 }
 0xa17   :  { %v1504_v23 = vrot.slane %v1503_v27, 1  ;;  %v1510_v29 = vadd.f32 %v1509_v28, %v1508_v47 }
 0xa19   :  { %v1505_v30 = vadd.f32 %v1504_v23, %v1503_v27  ;;  %v1511_v31 = vrot.slane %v1510_v29, 1 }
 0xa1b   :  { %v1512_v32 = vadd.f32 %v1511_v31, %v1510_v29  ;;  %v1513_v33 = vmul.f32 0.125, %v1505_v30 }
 0xa1d   :  { %v1514_v34 = vmul.f32 0.125, %v1512_v32  ;;  %v1515_v35 = vmul.f32 %v1513_v33, %v1513_v33  ;;  %v1520_v40 = vsub.f32 %v1494_v43, %v1513_v33 }
 0xa1f   :  { %v1516_v36 = vsub.f32 %v1514_v34, %v1515_v35 }
 0xa21   :  { %v1517_v37 = vadd.f32 1e-05, %v1516_v36 }
 0xa23   :  { %2062 = vrsqrt.f32 %v1517_v37 }
 0xa2d   :  { %v2063_v38 = vpop.eup %2062 }
 0xa2e   :  { %v1519_v42 = vmul.f32 %v2064_v39, %v2063_v38 }
 0xa30   :  { %v1524_v41 = vrot.slane %v1519_v42, %v2229_v44 }
 0xa32   :  { %v1525_v48 = vmul.f32 %v1524_v41, %v1520_v40 }
 0xa34   :  { %v1530_v49 = vadd.f32 %v1529_v46, %v1525_v48 }
 0xa36   :  { %1531 = vst [vmem:[%s2383_s3] sm:$0xff] %v1530_v49 }
 0xa37   :  { %1536 = vsyncpa [#allocation3], 1 }
 0xa38   :  { %1537 = vsyncpa [#allocation5], 1 }

</bundles_post_ra>
